<compile_context>
chip_gen: v5e
topology: v5e:2x2
jax: 0.10.0
libtpu: 0.0.40
codegen_flags: <defaults>
</compile_context>

<pallas_src>
import math
import jax
import jax.numpy as jnp
from jax.experimental import pallas as pl
from jax.experimental.pallas import tpu as pltpu  # noqa: F401  (TPU backend)

# ---- model hyperparameters (small, consistent with TransformerEncoderLayer) ----
SEQ = 8           # sequence length
BATCH = 2         # batch size
D_MODEL = 32      # d_model
NHEAD = 4         # number of attention heads
HEAD_DIM = D_MODEL // NHEAD
D_FF = 64         # dim_feedforward
NUM_LAYERS = 2    # number of encoder layers (deepcopied -> identical params)
LN_EPS = 1e-5     # PyTorch LayerNorm default
ROWS = SEQ * BATCH

# rows of the packed (8, 3*D_MODEL) bias / LayerNorm-parameter table
ROW_BQKV = 0   # [:, :3*D_MODEL]  fused q|k|v bias
ROW_BO = 1     # [:, :D_MODEL]    attention output-projection bias
ROW_G1 = 2     # [:, :D_MODEL]    LayerNorm1 gamma
ROW_BE1 = 3    # [:, :D_MODEL]    LayerNorm1 beta
ROW_B1 = 4     # [:, :D_FF]       FFN linear1 bias
ROW_B2 = 5     # [:, :D_MODEL]    FFN linear2 bias
ROW_G2 = 6     # [:, :D_MODEL]    LayerNorm2 gamma
ROW_BE2 = 7    # [:, :D_MODEL]    LayerNorm2 beta


def encoder_kernel(x_ref, wqkv_ref, wo_ref, w1_ref, w2_ref, vec_ref, o_ref):
    """All NUM_LAYERS encoder layers for the whole batch, fully VMEM-resident.

    x_ref: (ROWS, D) activations, rows in (s, b)-interleaved order.
    """
    x = x_ref[...]                                  # (ROWS, D)

    # load shared parameters once (identical across layers: deepcopied module)
    wqkv = wqkv_ref[...]                            # (D, 3D)
    wo = wo_ref[...]                                # (D, D)
    w1 = w1_ref[...]                                # (D, D_FF)
    w2 = w2_ref[...]                                # (D_FF, D)
    vec = vec_ref[...]                              # (8, 3D)

    bqkv = vec[ROW_BQKV:ROW_BQKV + 1, :]                   # (1, 3D)
    bo = vec[ROW_BO:ROW_BO + 1, :D_MODEL]                  # (1, D)
    g1 = vec[ROW_G1:ROW_G1 + 1, :D_MODEL]
    be1 = vec[ROW_BE1:ROW_BE1 + 1, :D_MODEL]
    b1 = vec[ROW_B1:ROW_B1 + 1, :D_FF]                     # (1, D_FF)
    b2 = vec[ROW_B2:ROW_B2 + 1, :D_MODEL]
    g2 = vec[ROW_G2:ROW_G2 + 1, :D_MODEL]
    be2 = vec[ROW_BE2:ROW_BE2 + 1, :D_MODEL]

    scale = 1.0 / math.sqrt(HEAD_DIM)

    # Block mask over the (ROWS, ROWS) score matrix: rows are (s, b)-interleaved,
    # so "same batch element" <=> same index modulo BATCH.  Hoisted out of the
    # layer loop (computed once).
    r = jax.lax.broadcasted_iota(jnp.int32, (ROWS, ROWS), 0)
    c = jax.lax.broadcasted_iota(jnp.int32, (ROWS, ROWS), 1)
    same_batch = (r % BATCH) == (c % BATCH)
    neg_big = jnp.float32(-1e30)

    def layer_norm(v, gamma, beta):
        mu = jnp.mean(v, axis=-1, keepdims=True)
        var = jnp.mean((v - mu) ** 2, axis=-1, keepdims=True)
        return (v - mu) * jax.lax.rsqrt(var + LN_EPS) * gamma + beta

    for _ in range(NUM_LAYERS):                     # fused layer stack (static)
        # --- multi-head self-attention: one fused QKV matmul over all rows ---
        qkv = jnp.dot(x, wqkv, preferred_element_type=jnp.float32) + bqkv  # (ROWS, 3D)

        ctx_heads = []
        for h in range(NHEAD):                      # static unrolled head loop
            lo = h * HEAD_DIM
            qs = qkv[:, lo:lo + HEAD_DIM]                               # (ROWS, Dh)
            ks = qkv[:, D_MODEL + lo:D_MODEL + lo + HEAD_DIM]           # (ROWS, Dh)
            vs = qkv[:, 2 * D_MODEL + lo:2 * D_MODEL + lo + HEAD_DIM]   # (ROWS, Dh)
            # qs @ ks.T without an explicit transpose (NT dot_general);
            # computes all batch elements at once, cross-batch blocks masked.
            s = jax.lax.dot_general(
                qs, ks, (((1,), (1,)), ((), ())),
                preferred_element_type=jnp.float32) * scale             # (ROWS, ROWS)
            s = jnp.where(same_batch, s, neg_big)
            s = s - jnp.max(s, axis=-1, keepdims=True)
            p = jnp.exp(s)                                               # masked -> 0
            p = p * pl.reciprocal(jnp.sum(p, axis=-1, keepdims=True), approx=True)
            ctx_heads.append(jnp.dot(p, vs, preferred_element_type=jnp.float32))

        ctx = jnp.concatenate(ctx_heads, axis=-1)                        # (ROWS, D)
        attn = jnp.dot(ctx, wo, preferred_element_type=jnp.float32) + bo

        # --- residual + LayerNorm 1 ---
        y = layer_norm(x + attn, g1, be1)

        # --- feed-forward (Linear -> ReLU -> Linear) ---
        h1 = jnp.dot(y, w1, preferred_element_type=jnp.float32) + b1
        h1 = jnp.maximum(h1, 0.0)
        h2 = jnp.dot(h1, w2, preferred_element_type=jnp.float32) + b2

        # --- residual + LayerNorm 2 ---
        x = layer_norm(y + h2, g2, be2)

    o_ref[...] = x


def transformer_encoder_ode(t, src_sbd, params):
    """Forward of TransformerEncoder_ode. `t` (ODE time) is unused.

    src_sbd: (S, B, D) float32 (PyTorch seq, batch, d_model layout).
    Returns (S, B, D).
    """
    del t
    wqkv, wo, w1, w2, vecs = params
    S, B, D = src_sbd.shape
    # Pure view: (S, B, D) -> (S*B, D), rows in (s, b)-interleaved order.
    # No transpose needed; the kernel's block mask handles batch separation.
    x2 = src_sbd.reshape(S * B, D)

    out2 = pl.pallas_call(
        encoder_kernel,
        out_shape=jax.ShapeDtypeStruct((S * B, D), jnp.float32),
    )(x2, wqkv, wo, w1, w2, vecs)

    # self.norm is None -> no final norm
    return out2.reshape(S, B, D)


def init_params(key):
    """Deterministic parameters matching TransformerEncoderLayer shapes.

    Weight matrices are stored pre-transposed (kernel computes x @ W).
    Q|K|V weights/biases are fused; all bias / LayerNorm vectors are packed
    into one (8, 3*D_MODEL) table (see ROW_* constants).
    Init does not bit-match PyTorch's xavier_uniform; forward math is identical.
    """
    ks = jax.random.split(key, 4)
    std = 0.02
    wqkv = jax.random.normal(ks[0], (D_MODEL, 3 * D_MODEL), jnp.float32) * std
    wo = jax.random.normal(ks[1], (D_MODEL, D_MODEL), jnp.float32) * std
    w1 = jax.random.normal(ks[2], (D_MODEL, D_FF), jnp.float32) * std
    w2 = jax.random.normal(ks[3], (D_FF, D_MODEL), jnp.float32) * std

    vecs = jnp.zeros((8, 3 * D_MODEL), jnp.float32)       # biases = 0
    vecs = vecs.at[ROW_G1, :D_MODEL].set(1.0)             # LN1 gamma = 1
    vecs = vecs.at[ROW_G2, :D_MODEL].set(1.0)             # LN2 gamma = 1
    return [wqkv, wo, w1, w2, vecs]


if __name__ == "__main__":
    root = jax.random.PRNGKey(0)
    k_src, k_par = jax.random.split(root)
    src = jax.random.normal(k_src, (SEQ, BATCH, D_MODEL), jnp.float32)   # (S, B, D)
    params = init_params(k_par)

    fwd = jax.jit(transformer_encoder_ode)
    out = fwd(jnp.float32(0.0), src, params)
    out = jax.block_until_ready(out)

    assert out.shape == (SEQ, BATCH, D_MODEL)
    assert jnp.all(jnp.isfinite(out))
    print("KERNEL_OK")
</pallas_src>

<mosaic_0001>
module attributes {stable_mosaic.version = 11 : i64} {
  func.func @encoder_kernel(%arg0: memref<16x32xf32, #tpu.memory_space<vmem>>, %arg1: memref<32x96xf32, #tpu.memory_space<vmem>>, %arg2: memref<32x32xf32, #tpu.memory_space<vmem>>, %arg3: memref<32x64xf32, #tpu.memory_space<vmem>>, %arg4: memref<64x32xf32, #tpu.memory_space<vmem>>, %arg5: memref<8x96xf32, #tpu.memory_space<vmem>>, %arg6: memref<16x32xf32, #tpu.memory_space<vmem>>) attributes {dimension_semantics = [], scalar_prefetch = 0 : i64, scratch_operands = 0 : i64, tpu.core_type = #tpu.core_type<tc>} {
    %c0 = arith.constant 0 : index
    %c0_0 = arith.constant 0 : index
    %0 = vector.load %arg0[%c0, %c0_0] : memref<16x32xf32, #tpu.memory_space<vmem>>, vector<16x32xf32>
    %c0_1 = arith.constant 0 : index
    %c0_2 = arith.constant 0 : index
    %1 = vector.load %arg1[%c0_1, %c0_2] : memref<32x96xf32, #tpu.memory_space<vmem>>, vector<32x96xf32>
    %c0_3 = arith.constant 0 : index
    %c0_4 = arith.constant 0 : index
    %2 = vector.load %arg2[%c0_3, %c0_4] : memref<32x32xf32, #tpu.memory_space<vmem>>, vector<32x32xf32>
    %c0_5 = arith.constant 0 : index
    %c0_6 = arith.constant 0 : index
    %3 = vector.load %arg3[%c0_5, %c0_6] : memref<32x64xf32, #tpu.memory_space<vmem>>, vector<32x64xf32>
    %c0_7 = arith.constant 0 : index
    %c0_8 = arith.constant 0 : index
    %4 = vector.load %arg4[%c0_7, %c0_8] : memref<64x32xf32, #tpu.memory_space<vmem>>, vector<64x32xf32>
    %c0_9 = arith.constant 0 : index
    %c0_10 = arith.constant 0 : index
    %5 = vector.load %arg5[%c0_9, %c0_10] : memref<8x96xf32, #tpu.memory_space<vmem>>, vector<8x96xf32>
    %6 = vector.extract_strided_slice %5 {offsets = [0, 0], sizes = [1, 96], strides = [1, 1]} : vector<8x96xf32> to vector<1x96xf32>
    %7 = vector.extract_strided_slice %5 {offsets = [1, 0], sizes = [1, 32], strides = [1, 1]} : vector<8x96xf32> to vector<1x32xf32>
    %8 = vector.extract_strided_slice %5 {offsets = [2, 0], sizes = [1, 32], strides = [1, 1]} : vector<8x96xf32> to vector<1x32xf32>
    %9 = vector.extract_strided_slice %5 {offsets = [3, 0], sizes = [1, 32], strides = [1, 1]} : vector<8x96xf32> to vector<1x32xf32>
    %10 = vector.extract_strided_slice %5 {offsets = [4, 0], sizes = [1, 64], strides = [1, 1]} : vector<8x96xf32> to vector<1x64xf32>
    %11 = vector.extract_strided_slice %5 {offsets = [5, 0], sizes = [1, 32], strides = [1, 1]} : vector<8x96xf32> to vector<1x32xf32>
    %12 = vector.extract_strided_slice %5 {offsets = [6, 0], sizes = [1, 32], strides = [1, 1]} : vector<8x96xf32> to vector<1x32xf32>
    %13 = vector.extract_strided_slice %5 {offsets = [7, 0], sizes = [1, 32], strides = [1, 1]} : vector<8x96xf32> to vector<1x32xf32>
    %14 = tpu.iota {dimensions = array<i32: 0>} : vector<16x16xi32>
    %15 = tpu.iota {dimensions = array<i32: 1>} : vector<16x16xi32>
    %c2_i32 = arith.constant 2 : i32
    %c0_i32 = arith.constant 0 : i32
    %16 = arith.cmpi eq, %c2_i32, %c0_i32 : i32
    %c1_i32 = arith.constant 1 : i32
    %17 = arith.select %16, %c1_i32, %c2_i32 : i32
    %18 = vector.broadcast %17 : i32 to vector<16x16xi32>
    %19 = arith.remsi %14, %18 : vector<16x16xi32>
    %c0_i32_11 = arith.constant 0 : i32
    %20 = vector.broadcast %c0_i32_11 : i32 to vector<16x16xi32>
    %21 = arith.cmpi ne, %19, %20 : vector<16x16xi32>
    %c0_i32_12 = arith.constant 0 : i32
    %22 = vector.broadcast %c0_i32_12 : i32 to vector<16x16xi32>
    %23 = arith.cmpi slt, %19, %22 : vector<16x16xi32>
    %c0_i32_13 = arith.constant 0 : i32
    %24 = arith.cmpi slt, %17, %c0_i32_13 : i32
    %25 = vector.broadcast %24 : i1 to vector<16x16xi1>
    %26 = vector.broadcast %25 : vector<16x16xi1> to vector<16x16xi1>
    %27 = arith.xori %23, %26 : vector<16x16xi1>
    %28 = arith.andi %27, %21 : vector<16x16xi1>
    %29 = vector.broadcast %17 : i32 to vector<16x16xi32>
    %30 = arith.addi %19, %29 : vector<16x16xi32>
    %31 = arith.select %28, %30, %19 : vector<16x16xi1>, vector<16x16xi32>
    %c2_i32_14 = arith.constant 2 : i32
    %c0_i32_15 = arith.constant 0 : i32
    %32 = arith.cmpi eq, %c2_i32_14, %c0_i32_15 : i32
    %c1_i32_16 = arith.constant 1 : i32
    %33 = arith.select %32, %c1_i32_16, %c2_i32_14 : i32
    %34 = vector.broadcast %33 : i32 to vector<16x16xi32>
    %35 = arith.remsi %15, %34 : vector<16x16xi32>
    %c0_i32_17 = arith.constant 0 : i32
    %36 = vector.broadcast %c0_i32_17 : i32 to vector<16x16xi32>
    %37 = arith.cmpi ne, %35, %36 : vector<16x16xi32>
    %c0_i32_18 = arith.constant 0 : i32
    %38 = vector.broadcast %c0_i32_18 : i32 to vector<16x16xi32>
    %39 = arith.cmpi slt, %35, %38 : vector<16x16xi32>
    %c0_i32_19 = arith.constant 0 : i32
    %40 = arith.cmpi slt, %33, %c0_i32_19 : i32
    %41 = vector.broadcast %40 : i1 to vector<16x16xi1>
    %42 = vector.broadcast %41 : vector<16x16xi1> to vector<16x16xi1>
    %43 = arith.xori %39, %42 : vector<16x16xi1>
    %44 = arith.andi %43, %37 : vector<16x16xi1>
    %45 = vector.broadcast %33 : i32 to vector<16x16xi32>
    %46 = arith.addi %35, %45 : vector<16x16xi32>
    %47 = arith.select %44, %46, %35 : vector<16x16xi1>, vector<16x16xi32>
    %48 = arith.cmpi eq, %31, %47 : vector<16x16xi32>
    %cst = arith.constant dense<0.000000e+00> : vector<16x96xf32>
    %49 = tpu.matmul %0, %1, %cst {dimension_numbers = #tpu.dot_dimension_numbers<[1], [0], [0], [1], [0, 0, 1, 1], [], []>} : vector<16x32xf32>, vector<32x96xf32>, vector<16x96xf32> -> vector<16x96xf32>
    %50 = vector.broadcast %6 : vector<1x96xf32> to vector<16x96xf32>
    %51 = arith.addf %49, %50 : vector<16x96xf32>
    %52 = vector.extract_strided_slice %51 {offsets = [0, 0], sizes = [16, 8], strides = [1, 1]} : vector<16x96xf32> to vector<16x8xf32>
    %53 = vector.extract_strided_slice %51 {offsets = [0, 32], sizes = [16, 8], strides = [1, 1]} : vector<16x96xf32> to vector<16x8xf32>
    %54 = vector.extract_strided_slice %51 {offsets = [0, 64], sizes = [16, 8], strides = [1, 1]} : vector<16x96xf32> to vector<16x8xf32>
    %cst_20 = arith.constant dense<0.000000e+00> : vector<16x16xf32>
    %55 = tpu.matmul %52, %53, %cst_20 {dimension_numbers = #tpu.dot_dimension_numbers<[1], [1], [0], [0], [0, 0, 1, 0], [], []>} : vector<16x8xf32>, vector<16x8xf32>, vector<16x16xf32> -> vector<16x16xf32>
    %cst_21 = arith.constant 0.353553385 : f32
    %56 = vector.broadcast %cst_21 : f32 to vector<16x16xf32>
    %57 = arith.mulf %55, %56 : vector<16x16xf32>
    %cst_22 = arith.constant -1.000000e+30 : f32
    %58 = vector.broadcast %cst_22 : f32 to vector<16x16xf32>
    %59 = arith.select %48, %57, %58 : vector<16x16xi1>, vector<16x16xf32>
    %cst_23 = arith.constant dense<0xFF800000> : vector<16xf32>
    %60 = vector.multi_reduction <maximumf>, %59, %cst_23 [1] : vector<16x16xf32> to vector<16xf32>
    %61 = vector.shape_cast %60 : vector<16xf32> to vector<16x1xf32>
    %62 = vector.broadcast %61 : vector<16x1xf32> to vector<16x16xf32>
    %63 = arith.subf %59, %62 : vector<16x16xf32>
    %64 = math.exp %63 : vector<16x16xf32>
    %cst_24 = arith.constant dense<0.000000e+00> : vector<16xf32>
    %65 = vector.multi_reduction <add>, %64, %cst_24 [1] : vector<16x16xf32> to vector<16xf32>
    %66 = vector.shape_cast %65 : vector<16xf32> to vector<16x1xf32>
    %67 = tpu.reciprocal %66 {approx = true} : vector<16x1xf32> -> vector<16x1xf32>
    %68 = vector.broadcast %67 : vector<16x1xf32> to vector<16x16xf32>
    %69 = arith.mulf %64, %68 : vector<16x16xf32>
    %cst_25 = arith.constant dense<0.000000e+00> : vector<16x8xf32>
    %70 = tpu.matmul %69, %54, %cst_25 {dimension_numbers = #tpu.dot_dimension_numbers<[1], [0], [0], [1], [0, 0, 1, 1], [], []>} : vector<16x16xf32>, vector<16x8xf32>, vector<16x8xf32> -> vector<16x8xf32>
    %71 = vector.extract_strided_slice %51 {offsets = [0, 8], sizes = [16, 8], strides = [1, 1]} : vector<16x96xf32> to vector<16x8xf32>
    %72 = vector.extract_strided_slice %51 {offsets = [0, 40], sizes = [16, 8], strides = [1, 1]} : vector<16x96xf32> to vector<16x8xf32>
    %73 = vector.extract_strided_slice %51 {offsets = [0, 72], sizes = [16, 8], strides = [1, 1]} : vector<16x96xf32> to vector<16x8xf32>
    %cst_26 = arith.constant dense<0.000000e+00> : vector<16x16xf32>
    %74 = tpu.matmul %71, %72, %cst_26 {dimension_numbers = #tpu.dot_dimension_numbers<[1], [1], [0], [0], [0, 0, 1, 0], [], []>} : vector<16x8xf32>, vector<16x8xf32>, vector<16x16xf32> -> vector<16x16xf32>
    %cst_27 = arith.constant 0.353553385 : f32
    %75 = vector.broadcast %cst_27 : f32 to vector<16x16xf32>
    %76 = arith.mulf %74, %75 : vector<16x16xf32>
    %cst_28 = arith.constant -1.000000e+30 : f32
    %77 = vector.broadcast %cst_28 : f32 to vector<16x16xf32>
    %78 = arith.select %48, %76, %77 : vector<16x16xi1>, vector<16x16xf32>
    %cst_29 = arith.constant dense<0xFF800000> : vector<16xf32>
    %79 = vector.multi_reduction <maximumf>, %78, %cst_29 [1] : vector<16x16xf32> to vector<16xf32>
    %80 = vector.shape_cast %79 : vector<16xf32> to vector<16x1xf32>
    %81 = vector.broadcast %80 : vector<16x1xf32> to vector<16x16xf32>
    %82 = arith.subf %78, %81 : vector<16x16xf32>
    %83 = math.exp %82 : vector<16x16xf32>
    %cst_30 = arith.constant dense<0.000000e+00> : vector<16xf32>
    %84 = vector.multi_reduction <add>, %83, %cst_30 [1] : vector<16x16xf32> to vector<16xf32>
    %85 = vector.shape_cast %84 : vector<16xf32> to vector<16x1xf32>
    %86 = tpu.reciprocal %85 {approx = true} : vector<16x1xf32> -> vector<16x1xf32>
    %87 = vector.broadcast %86 : vector<16x1xf32> to vector<16x16xf32>
    %88 = arith.mulf %83, %87 : vector<16x16xf32>
    %cst_31 = arith.constant dense<0.000000e+00> : vector<16x8xf32>
    %89 = tpu.matmul %88, %73, %cst_31 {dimension_numbers = #tpu.dot_dimension_numbers<[1], [0], [0], [1], [0, 0, 1, 1], [], []>} : vector<16x16xf32>, vector<16x8xf32>, vector<16x8xf32> -> vector<16x8xf32>
    %90 = vector.extract_strided_slice %51 {offsets = [0, 16], sizes = [16, 8], strides = [1, 1]} : vector<16x96xf32> to vector<16x8xf32>
    %91 = vector.extract_strided_slice %51 {offsets = [0, 48], sizes = [16, 8], strides = [1, 1]} : vector<16x96xf32> to vector<16x8xf32>
    %92 = vector.extract_strided_slice %51 {offsets = [0, 80], sizes = [16, 8], strides = [1, 1]} : vector<16x96xf32> to vector<16x8xf32>
    %cst_32 = arith.constant dense<0.000000e+00> : vector<16x16xf32>
    %93 = tpu.matmul %90, %91, %cst_32 {dimension_numbers = #tpu.dot_dimension_numbers<[1], [1], [0], [0], [0, 0, 1, 0], [], []>} : vector<16x8xf32>, vector<16x8xf32>, vector<16x16xf32> -> vector<16x16xf32>
    %cst_33 = arith.constant 0.353553385 : f32
    %94 = vector.broadcast %cst_33 : f32 to vector<16x16xf32>
    %95 = arith.mulf %93, %94 : vector<16x16xf32>
    %cst_34 = arith.constant -1.000000e+30 : f32
    %96 = vector.broadcast %cst_34 : f32 to vector<16x16xf32>
    %97 = arith.select %48, %95, %96 : vector<16x16xi1>, vector<16x16xf32>
    %cst_35 = arith.constant dense<0xFF800000> : vector<16xf32>
    %98 = vector.multi_reduction <maximumf>, %97, %cst_35 [1] : vector<16x16xf32> to vector<16xf32>
    %99 = vector.shape_cast %98 : vector<16xf32> to vector<16x1xf32>
    %100 = vector.broadcast %99 : vector<16x1xf32> to vector<16x16xf32>
    %101 = arith.subf %97, %100 : vector<16x16xf32>
    %102 = math.exp %101 : vector<16x16xf32>
    %cst_36 = arith.constant dense<0.000000e+00> : vector<16xf32>
    %103 = vector.multi_reduction <add>, %102, %cst_36 [1] : vector<16x16xf32> to vector<16xf32>
    %104 = vector.shape_cast %103 : vector<16xf32> to vector<16x1xf32>
    %105 = tpu.reciprocal %104 {approx = true} : vector<16x1xf32> -> vector<16x1xf32>
    %106 = vector.broadcast %105 : vector<16x1xf32> to vector<16x16xf32>
    %107 = arith.mulf %102, %106 : vector<16x16xf32>
    %cst_37 = arith.constant dense<0.000000e+00> : vector<16x8xf32>
    %108 = tpu.matmul %107, %92, %cst_37 {dimension_numbers = #tpu.dot_dimension_numbers<[1], [0], [0], [1], [0, 0, 1, 1], [], []>} : vector<16x16xf32>, vector<16x8xf32>, vector<16x8xf32> -> vector<16x8xf32>
    %109 = vector.extract_strided_slice %51 {offsets = [0, 24], sizes = [16, 8], strides = [1, 1]} : vector<16x96xf32> to vector<16x8xf32>
    %110 = vector.extract_strided_slice %51 {offsets = [0, 56], sizes = [16, 8], strides = [1, 1]} : vector<16x96xf32> to vector<16x8xf32>
    %111 = vector.extract_strided_slice %51 {offsets = [0, 88], sizes = [16, 8], strides = [1, 1]} : vector<16x96xf32> to vector<16x8xf32>
    %cst_38 = arith.constant dense<0.000000e+00> : vector<16x16xf32>
    %112 = tpu.matmul %109, %110, %cst_38 {dimension_numbers = #tpu.dot_dimension_numbers<[1], [1], [0], [0], [0, 0, 1, 0], [], []>} : vector<16x8xf32>, vector<16x8xf32>, vector<16x16xf32> -> vector<16x16xf32>
    %cst_39 = arith.constant 0.353553385 : f32
    %113 = vector.broadcast %cst_39 : f32 to vector<16x16xf32>
    %114 = arith.mulf %112, %113 : vector<16x16xf32>
    %cst_40 = arith.constant -1.000000e+30 : f32
    %115 = vector.broadcast %cst_40 : f32 to vector<16x16xf32>
    %116 = arith.select %48, %114, %115 : vector<16x16xi1>, vector<16x16xf32>
    %cst_41 = arith.constant dense<0xFF800000> : vector<16xf32>
    %117 = vector.multi_reduction <maximumf>, %116, %cst_41 [1] : vector<16x16xf32> to vector<16xf32>
    %118 = vector.shape_cast %117 : vector<16xf32> to vector<16x1xf32>
    %119 = vector.broadcast %118 : vector<16x1xf32> to vector<16x16xf32>
    %120 = arith.subf %116, %119 : vector<16x16xf32>
    %121 = math.exp %120 : vector<16x16xf32>
    %cst_42 = arith.constant dense<0.000000e+00> : vector<16xf32>
    %122 = vector.multi_reduction <add>, %121, %cst_42 [1] : vector<16x16xf32> to vector<16xf32>
    %123 = vector.shape_cast %122 : vector<16xf32> to vector<16x1xf32>
    %124 = tpu.reciprocal %123 {approx = true} : vector<16x1xf32> -> vector<16x1xf32>
    %125 = vector.broadcast %124 : vector<16x1xf32> to vector<16x16xf32>
    %126 = arith.mulf %121, %125 : vector<16x16xf32>
    %cst_43 = arith.constant dense<0.000000e+00> : vector<16x8xf32>
    %127 = tpu.matmul %126, %111, %cst_43 {dimension_numbers = #tpu.dot_dimension_numbers<[1], [0], [0], [1], [0, 0, 1, 1], [], []>} : vector<16x16xf32>, vector<16x8xf32>, vector<16x8xf32> -> vector<16x8xf32>
    %128 = tpu.concatenate %70, %89, %108, %127 in 1 : vector<16x8xf32>, vector<16x8xf32>, vector<16x8xf32>, vector<16x8xf32> -> vector<16x32xf32>
    %cst_44 = arith.constant dense<0.000000e+00> : vector<16x32xf32>
    %129 = tpu.matmul %128, %2, %cst_44 {dimension_numbers = #tpu.dot_dimension_numbers<[1], [0], [0], [1], [0, 0, 1, 1], [], []>} : vector<16x32xf32>, vector<32x32xf32>, vector<16x32xf32> -> vector<16x32xf32>
    %130 = vector.broadcast %7 : vector<1x32xf32> to vector<16x32xf32>
    %131 = arith.addf %129, %130 : vector<16x32xf32>
    %132 = arith.addf %0, %131 : vector<16x32xf32>
    %cst_45 = arith.constant dense<0.000000e+00> : vector<16xf32>
    %133 = vector.multi_reduction <add>, %132, %cst_45 [1] : vector<16x32xf32> to vector<16xf32>
    %134 = vector.shape_cast %133 : vector<16xf32> to vector<16x1xf32>
    %cst_46 = arith.constant 3.200000e+01 : f32
    %135 = vector.broadcast %cst_46 : f32 to vector<16x1xf32>
    %136 = arith.divf %134, %135 : vector<16x1xf32>
    %137 = vector.broadcast %136 : vector<16x1xf32> to vector<16x32xf32>
    %138 = arith.subf %132, %137 : vector<16x32xf32>
    %139 = arith.mulf %138, %138 : vector<16x32xf32>
    %cst_47 = arith.constant dense<0.000000e+00> : vector<16xf32>
    %140 = vector.multi_reduction <add>, %139, %cst_47 [1] : vector<16x32xf32> to vector<16xf32>
    %141 = vector.shape_cast %140 : vector<16xf32> to vector<16x1xf32>
    %cst_48 = arith.constant 3.200000e+01 : f32
    %142 = vector.broadcast %cst_48 : f32 to vector<16x1xf32>
    %143 = arith.divf %141, %142 : vector<16x1xf32>
    %144 = vector.broadcast %136 : vector<16x1xf32> to vector<16x32xf32>
    %145 = arith.subf %132, %144 : vector<16x32xf32>
    %cst_49 = arith.constant 9.99999974E-6 : f32
    %146 = vector.broadcast %cst_49 : f32 to vector<16x1xf32>
    %147 = arith.addf %143, %146 : vector<16x1xf32>
    %148 = math.rsqrt %147 : vector<16x1xf32>
    %149 = vector.broadcast %148 : vector<16x1xf32> to vector<16x32xf32>
    %150 = arith.mulf %145, %149 : vector<16x32xf32>
    %151 = vector.broadcast %8 : vector<1x32xf32> to vector<16x32xf32>
    %152 = arith.mulf %150, %151 : vector<16x32xf32>
    %153 = vector.broadcast %9 : vector<1x32xf32> to vector<16x32xf32>
    %154 = arith.addf %152, %153 : vector<16x32xf32>
    %cst_50 = arith.constant dense<0.000000e+00> : vector<16x64xf32>
    %155 = tpu.matmul %154, %3, %cst_50 {dimension_numbers = #tpu.dot_dimension_numbers<[1], [0], [0], [1], [0, 0, 1, 1], [], []>} : vector<16x32xf32>, vector<32x64xf32>, vector<16x64xf32> -> vector<16x64xf32>
    %156 = vector.broadcast %10 : vector<1x64xf32> to vector<16x64xf32>
    %157 = arith.addf %155, %156 : vector<16x64xf32>
    %cst_51 = arith.constant 0.000000e+00 : f32
    %158 = vector.broadcast %cst_51 : f32 to vector<16x64xf32>
    %159 = arith.maximumf %157, %158 : vector<16x64xf32>
    %cst_52 = arith.constant dense<0.000000e+00> : vector<16x32xf32>
    %160 = tpu.matmul %159, %4, %cst_52 {dimension_numbers = #tpu.dot_dimension_numbers<[1], [0], [0], [1], [0, 0, 1, 1], [], []>} : vector<16x64xf32>, vector<64x32xf32>, vector<16x32xf32> -> vector<16x32xf32>
    %161 = vector.broadcast %11 : vector<1x32xf32> to vector<16x32xf32>
    %162 = arith.addf %160, %161 : vector<16x32xf32>
    %163 = arith.addf %154, %162 : vector<16x32xf32>
    %cst_53 = arith.constant dense<0.000000e+00> : vector<16xf32>
    %164 = vector.multi_reduction <add>, %163, %cst_53 [1] : vector<16x32xf32> to vector<16xf32>
    %165 = vector.shape_cast %164 : vector<16xf32> to vector<16x1xf32>
    %cst_54 = arith.constant 3.200000e+01 : f32
    %166 = vector.broadcast %cst_54 : f32 to vector<16x1xf32>
    %167 = arith.divf %165, %166 : vector<16x1xf32>
    %168 = vector.broadcast %167 : vector<16x1xf32> to vector<16x32xf32>
    %169 = arith.subf %163, %168 : vector<16x32xf32>
    %170 = arith.mulf %169, %169 : vector<16x32xf32>
    %cst_55 = arith.constant dense<0.000000e+00> : vector<16xf32>
    %171 = vector.multi_reduction <add>, %170, %cst_55 [1] : vector<16x32xf32> to vector<16xf32>
    %172 = vector.shape_cast %171 : vector<16xf32> to vector<16x1xf32>
    %cst_56 = arith.constant 3.200000e+01 : f32
    %173 = vector.broadcast %cst_56 : f32 to vector<16x1xf32>
    %174 = arith.divf %172, %173 : vector<16x1xf32>
    %175 = vector.broadcast %167 : vector<16x1xf32> to vector<16x32xf32>
    %176 = arith.subf %163, %175 : vector<16x32xf32>
    %cst_57 = arith.constant 9.99999974E-6 : f32
    %177 = vector.broadcast %cst_57 : f32 to vector<16x1xf32>
    %178 = arith.addf %174, %177 : vector<16x1xf32>
    %179 = math.rsqrt %178 : vector<16x1xf32>
    %180 = vector.broadcast %179 : vector<16x1xf32> to vector<16x32xf32>
    %181 = arith.mulf %176, %180 : vector<16x32xf32>
    %182 = vector.broadcast %12 : vector<1x32xf32> to vector<16x32xf32>
    %183 = arith.mulf %181, %182 : vector<16x32xf32>
    %184 = vector.broadcast %13 : vector<1x32xf32> to vector<16x32xf32>
    %185 = arith.addf %183, %184 : vector<16x32xf32>
    %cst_58 = arith.constant dense<0.000000e+00> : vector<16x96xf32>
    %186 = tpu.matmul %185, %1, %cst_58 {dimension_numbers = #tpu.dot_dimension_numbers<[1], [0], [0], [1], [0, 0, 1, 1], [], []>} : vector<16x32xf32>, vector<32x96xf32>, vector<16x96xf32> -> vector<16x96xf32>
    %187 = vector.broadcast %6 : vector<1x96xf32> to vector<16x96xf32>
    %188 = arith.addf %186, %187 : vector<16x96xf32>
    %189 = vector.extract_strided_slice %188 {offsets = [0, 0], sizes = [16, 8], strides = [1, 1]} : vector<16x96xf32> to vector<16x8xf32>
    %190 = vector.extract_strided_slice %188 {offsets = [0, 32], sizes = [16, 8], strides = [1, 1]} : vector<16x96xf32> to vector<16x8xf32>
    %191 = vector.extract_strided_slice %188 {offsets = [0, 64], sizes = [16, 8], strides = [1, 1]} : vector<16x96xf32> to vector<16x8xf32>
    %cst_59 = arith.constant dense<0.000000e+00> : vector<16x16xf32>
    %192 = tpu.matmul %189, %190, %cst_59 {dimension_numbers = #tpu.dot_dimension_numbers<[1], [1], [0], [0], [0, 0, 1, 0], [], []>} : vector<16x8xf32>, vector<16x8xf32>, vector<16x16xf32> -> vector<16x16xf32>
    %cst_60 = arith.constant 0.353553385 : f32
    %193 = vector.broadcast %cst_60 : f32 to vector<16x16xf32>
    %194 = arith.mulf %192, %193 : vector<16x16xf32>
    %cst_61 = arith.constant -1.000000e+30 : f32
    %195 = vector.broadcast %cst_61 : f32 to vector<16x16xf32>
    %196 = arith.select %48, %194, %195 : vector<16x16xi1>, vector<16x16xf32>
    %cst_62 = arith.constant dense<0xFF800000> : vector<16xf32>
    %197 = vector.multi_reduction <maximumf>, %196, %cst_62 [1] : vector<16x16xf32> to vector<16xf32>
    %198 = vector.shape_cast %197 : vector<16xf32> to vector<16x1xf32>
    %199 = vector.broadcast %198 : vector<16x1xf32> to vector<16x16xf32>
    %200 = arith.subf %196, %199 : vector<16x16xf32>
    %201 = math.exp %200 : vector<16x16xf32>
    %cst_63 = arith.constant dense<0.000000e+00> : vector<16xf32>
    %202 = vector.multi_reduction <add>, %201, %cst_63 [1] : vector<16x16xf32> to vector<16xf32>
    %203 = vector.shape_cast %202 : vector<16xf32> to vector<16x1xf32>
    %204 = tpu.reciprocal %203 {approx = true} : vector<16x1xf32> -> vector<16x1xf32>
    %205 = vector.broadcast %204 : vector<16x1xf32> to vector<16x16xf32>
    %206 = arith.mulf %201, %205 : vector<16x16xf32>
    %cst_64 = arith.constant dense<0.000000e+00> : vector<16x8xf32>
    %207 = tpu.matmul %206, %191, %cst_64 {dimension_numbers = #tpu.dot_dimension_numbers<[1], [0], [0], [1], [0, 0, 1, 1], [], []>} : vector<16x16xf32>, vector<16x8xf32>, vector<16x8xf32> -> vector<16x8xf32>
    %208 = vector.extract_strided_slice %188 {offsets = [0, 8], sizes = [16, 8], strides = [1, 1]} : vector<16x96xf32> to vector<16x8xf32>
    %209 = vector.extract_strided_slice %188 {offsets = [0, 40], sizes = [16, 8], strides = [1, 1]} : vector<16x96xf32> to vector<16x8xf32>
    %210 = vector.extract_strided_slice %188 {offsets = [0, 72], sizes = [16, 8], strides = [1, 1]} : vector<16x96xf32> to vector<16x8xf32>
    %cst_65 = arith.constant dense<0.000000e+00> : vector<16x16xf32>
    %211 = tpu.matmul %208, %209, %cst_65 {dimension_numbers = #tpu.dot_dimension_numbers<[1], [1], [0], [0], [0, 0, 1, 0], [], []>} : vector<16x8xf32>, vector<16x8xf32>, vector<16x16xf32> -> vector<16x16xf32>
    %cst_66 = arith.constant 0.353553385 : f32
    %212 = vector.broadcast %cst_66 : f32 to vector<16x16xf32>
    %213 = arith.mulf %211, %212 : vector<16x16xf32>
    %cst_67 = arith.constant -1.000000e+30 : f32
    %214 = vector.broadcast %cst_67 : f32 to vector<16x16xf32>
    %215 = arith.select %48, %213, %214 : vector<16x16xi1>, vector<16x16xf32>
    %cst_68 = arith.constant dense<0xFF800000> : vector<16xf32>
    %216 = vector.multi_reduction <maximumf>, %215, %cst_68 [1] : vector<16x16xf32> to vector<16xf32>
    %217 = vector.shape_cast %216 : vector<16xf32> to vector<16x1xf32>
    %218 = vector.broadcast %217 : vector<16x1xf32> to vector<16x16xf32>
    %219 = arith.subf %215, %218 : vector<16x16xf32>
    %220 = math.exp %219 : vector<16x16xf32>
    %cst_69 = arith.constant dense<0.000000e+00> : vector<16xf32>
    %221 = vector.multi_reduction <add>, %220, %cst_69 [1] : vector<16x16xf32> to vector<16xf32>
    %222 = vector.shape_cast %221 : vector<16xf32> to vector<16x1xf32>
    %223 = tpu.reciprocal %222 {approx = true} : vector<16x1xf32> -> vector<16x1xf32>
    %224 = vector.broadcast %223 : vector<16x1xf32> to vector<16x16xf32>
    %225 = arith.mulf %220, %224 : vector<16x16xf32>
    %cst_70 = arith.constant dense<0.000000e+00> : vector<16x8xf32>
    %226 = tpu.matmul %225, %210, %cst_70 {dimension_numbers = #tpu.dot_dimension_numbers<[1], [0], [0], [1], [0, 0, 1, 1], [], []>} : vector<16x16xf32>, vector<16x8xf32>, vector<16x8xf32> -> vector<16x8xf32>
    %227 = vector.extract_strided_slice %188 {offsets = [0, 16], sizes = [16, 8], strides = [1, 1]} : vector<16x96xf32> to vector<16x8xf32>
    %228 = vector.extract_strided_slice %188 {offsets = [0, 48], sizes = [16, 8], strides = [1, 1]} : vector<16x96xf32> to vector<16x8xf32>
    %229 = vector.extract_strided_slice %188 {offsets = [0, 80], sizes = [16, 8], strides = [1, 1]} : vector<16x96xf32> to vector<16x8xf32>
    %cst_71 = arith.constant dense<0.000000e+00> : vector<16x16xf32>
    %230 = tpu.matmul %227, %228, %cst_71 {dimension_numbers = #tpu.dot_dimension_numbers<[1], [1], [0], [0], [0, 0, 1, 0], [], []>} : vector<16x8xf32>, vector<16x8xf32>, vector<16x16xf32> -> vector<16x16xf32>
    %cst_72 = arith.constant 0.353553385 : f32
    %231 = vector.broadcast %cst_72 : f32 to vector<16x16xf32>
    %232 = arith.mulf %230, %231 : vector<16x16xf32>
    %cst_73 = arith.constant -1.000000e+30 : f32
    %233 = vector.broadcast %cst_73 : f32 to vector<16x16xf32>
    %234 = arith.select %48, %232, %233 : vector<16x16xi1>, vector<16x16xf32>
    %cst_74 = arith.constant dense<0xFF800000> : vector<16xf32>
    %235 = vector.multi_reduction <maximumf>, %234, %cst_74 [1] : vector<16x16xf32> to vector<16xf32>
    %236 = vector.shape_cast %235 : vector<16xf32> to vector<16x1xf32>
    %237 = vector.broadcast %236 : vector<16x1xf32> to vector<16x16xf32>
    %238 = arith.subf %234, %237 : vector<16x16xf32>
    %239 = math.exp %238 : vector<16x16xf32>
    %cst_75 = arith.constant dense<0.000000e+00> : vector<16xf32>
    %240 = vector.multi_reduction <add>, %239, %cst_75 [1] : vector<16x16xf32> to vector<16xf32>
    %241 = vector.shape_cast %240 : vector<16xf32> to vector<16x1xf32>
    %242 = tpu.reciprocal %241 {approx = true} : vector<16x1xf32> -> vector<16x1xf32>
    %243 = vector.broadcast %242 : vector<16x1xf32> to vector<16x16xf32>
    %244 = arith.mulf %239, %243 : vector<16x16xf32>
    %cst_76 = arith.constant dense<0.000000e+00> : vector<16x8xf32>
    %245 = tpu.matmul %244, %229, %cst_76 {dimension_numbers = #tpu.dot_dimension_numbers<[1], [0], [0], [1], [0, 0, 1, 1], [], []>} : vector<16x16xf32>, vector<16x8xf32>, vector<16x8xf32> -> vector<16x8xf32>
    %246 = vector.extract_strided_slice %188 {offsets = [0, 24], sizes = [16, 8], strides = [1, 1]} : vector<16x96xf32> to vector<16x8xf32>
    %247 = vector.extract_strided_slice %188 {offsets = [0, 56], sizes = [16, 8], strides = [1, 1]} : vector<16x96xf32> to vector<16x8xf32>
    %248 = vector.extract_strided_slice %188 {offsets = [0, 88], sizes = [16, 8], strides = [1, 1]} : vector<16x96xf32> to vector<16x8xf32>
    %cst_77 = arith.constant dense<0.000000e+00> : vector<16x16xf32>
    %249 = tpu.matmul %246, %247, %cst_77 {dimension_numbers = #tpu.dot_dimension_numbers<[1], [1], [0], [0], [0, 0, 1, 0], [], []>} : vector<16x8xf32>, vector<16x8xf32>, vector<16x16xf32> -> vector<16x16xf32>
    %cst_78 = arith.constant 0.353553385 : f32
    %250 = vector.broadcast %cst_78 : f32 to vector<16x16xf32>
    %251 = arith.mulf %249, %250 : vector<16x16xf32>
    %cst_79 = arith.constant -1.000000e+30 : f32
    %252 = vector.broadcast %cst_79 : f32 to vector<16x16xf32>
    %253 = arith.select %48, %251, %252 : vector<16x16xi1>, vector<16x16xf32>
    %cst_80 = arith.constant dense<0xFF800000> : vector<16xf32>
    %254 = vector.multi_reduction <maximumf>, %253, %cst_80 [1] : vector<16x16xf32> to vector<16xf32>
    %255 = vector.shape_cast %254 : vector<16xf32> to vector<16x1xf32>
    %256 = vector.broadcast %255 : vector<16x1xf32> to vector<16x16xf32>
    %257 = arith.subf %253, %256 : vector<16x16xf32>
    %258 = math.exp %257 : vector<16x16xf32>
    %cst_81 = arith.constant dense<0.000000e+00> : vector<16xf32>
    %259 = vector.multi_reduction <add>, %258, %cst_81 [1] : vector<16x16xf32> to vector<16xf32>
    %260 = vector.shape_cast %259 : vector<16xf32> to vector<16x1xf32>
    %261 = tpu.reciprocal %260 {approx = true} : vector<16x1xf32> -> vector<16x1xf32>
    %262 = vector.broadcast %261 : vector<16x1xf32> to vector<16x16xf32>
    %263 = arith.mulf %258, %262 : vector<16x16xf32>
    %cst_82 = arith.constant dense<0.000000e+00> : vector<16x8xf32>
    %264 = tpu.matmul %263, %248, %cst_82 {dimension_numbers = #tpu.dot_dimension_numbers<[1], [0], [0], [1], [0, 0, 1, 1], [], []>} : vector<16x16xf32>, vector<16x8xf32>, vector<16x8xf32> -> vector<16x8xf32>
    %265 = tpu.concatenate %207, %226, %245, %264 in 1 : vector<16x8xf32>, vector<16x8xf32>, vector<16x8xf32>, vector<16x8xf32> -> vector<16x32xf32>
    %cst_83 = arith.constant dense<0.000000e+00> : vector<16x32xf32>
    %266 = tpu.matmul %265, %2, %cst_83 {dimension_numbers = #tpu.dot_dimension_numbers<[1], [0], [0], [1], [0, 0, 1, 1], [], []>} : vector<16x32xf32>, vector<32x32xf32>, vector<16x32xf32> -> vector<16x32xf32>
    %267 = vector.broadcast %7 : vector<1x32xf32> to vector<16x32xf32>
    %268 = arith.addf %266, %267 : vector<16x32xf32>
    %269 = arith.addf %185, %268 : vector<16x32xf32>
    %cst_84 = arith.constant dense<0.000000e+00> : vector<16xf32>
    %270 = vector.multi_reduction <add>, %269, %cst_84 [1] : vector<16x32xf32> to vector<16xf32>
    %271 = vector.shape_cast %270 : vector<16xf32> to vector<16x1xf32>
    %cst_85 = arith.constant 3.200000e+01 : f32
    %272 = vector.broadcast %cst_85 : f32 to vector<16x1xf32>
    %273 = arith.divf %271, %272 : vector<16x1xf32>
    %274 = vector.broadcast %273 : vector<16x1xf32> to vector<16x32xf32>
    %275 = arith.subf %269, %274 : vector<16x32xf32>
    %276 = arith.mulf %275, %275 : vector<16x32xf32>
    %cst_86 = arith.constant dense<0.000000e+00> : vector<16xf32>
    %277 = vector.multi_reduction <add>, %276, %cst_86 [1] : vector<16x32xf32> to vector<16xf32>
    %278 = vector.shape_cast %277 : vector<16xf32> to vector<16x1xf32>
    %cst_87 = arith.constant 3.200000e+01 : f32
    %279 = vector.broadcast %cst_87 : f32 to vector<16x1xf32>
    %280 = arith.divf %278, %279 : vector<16x1xf32>
    %281 = vector.broadcast %273 : vector<16x1xf32> to vector<16x32xf32>
    %282 = arith.subf %269, %281 : vector<16x32xf32>
    %cst_88 = arith.constant 9.99999974E-6 : f32
    %283 = vector.broadcast %cst_88 : f32 to vector<16x1xf32>
    %284 = arith.addf %280, %283 : vector<16x1xf32>
    %285 = math.rsqrt %284 : vector<16x1xf32>
    %286 = vector.broadcast %285 : vector<16x1xf32> to vector<16x32xf32>
    %287 = arith.mulf %282, %286 : vector<16x32xf32>
    %288 = vector.broadcast %8 : vector<1x32xf32> to vector<16x32xf32>
    %289 = arith.mulf %287, %288 : vector<16x32xf32>
    %290 = vector.broadcast %9 : vector<1x32xf32> to vector<16x32xf32>
    %291 = arith.addf %289, %290 : vector<16x32xf32>
    %cst_89 = arith.constant dense<0.000000e+00> : vector<16x64xf32>
    %292 = tpu.matmul %291, %3, %cst_89 {dimension_numbers = #tpu.dot_dimension_numbers<[1], [0], [0], [1], [0, 0, 1, 1], [], []>} : vector<16x32xf32>, vector<32x64xf32>, vector<16x64xf32> -> vector<16x64xf32>
    %293 = vector.broadcast %10 : vector<1x64xf32> to vector<16x64xf32>
    %294 = arith.addf %292, %293 : vector<16x64xf32>
    %cst_90 = arith.constant 0.000000e+00 : f32
    %295 = vector.broadcast %cst_90 : f32 to vector<16x64xf32>
    %296 = arith.maximumf %294, %295 : vector<16x64xf32>
    %cst_91 = arith.constant dense<0.000000e+00> : vector<16x32xf32>
    %297 = tpu.matmul %296, %4, %cst_91 {dimension_numbers = #tpu.dot_dimension_numbers<[1], [0], [0], [1], [0, 0, 1, 1], [], []>} : vector<16x64xf32>, vector<64x32xf32>, vector<16x32xf32> -> vector<16x32xf32>
    %298 = vector.broadcast %11 : vector<1x32xf32> to vector<16x32xf32>
    %299 = arith.addf %297, %298 : vector<16x32xf32>
    %300 = arith.addf %291, %299 : vector<16x32xf32>
    %cst_92 = arith.constant dense<0.000000e+00> : vector<16xf32>
    %301 = vector.multi_reduction <add>, %300, %cst_92 [1] : vector<16x32xf32> to vector<16xf32>
    %302 = vector.shape_cast %301 : vector<16xf32> to vector<16x1xf32>
    %cst_93 = arith.constant 3.200000e+01 : f32
    %303 = vector.broadcast %cst_93 : f32 to vector<16x1xf32>
    %304 = arith.divf %302, %303 : vector<16x1xf32>
    %305 = vector.broadcast %304 : vector<16x1xf32> to vector<16x32xf32>
    %306 = arith.subf %300, %305 : vector<16x32xf32>
    %307 = arith.mulf %306, %306 : vector<16x32xf32>
    %cst_94 = arith.constant dense<0.000000e+00> : vector<16xf32>
    %308 = vector.multi_reduction <add>, %307, %cst_94 [1] : vector<16x32xf32> to vector<16xf32>
    %309 = vector.shape_cast %308 : vector<16xf32> to vector<16x1xf32>
    %cst_95 = arith.constant 3.200000e+01 : f32
    %310 = vector.broadcast %cst_95 : f32 to vector<16x1xf32>
    %311 = arith.divf %309, %310 : vector<16x1xf32>
    %312 = vector.broadcast %304 : vector<16x1xf32> to vector<16x32xf32>
    %313 = arith.subf %300, %312 : vector<16x32xf32>
    %cst_96 = arith.constant 9.99999974E-6 : f32
    %314 = vector.broadcast %cst_96 : f32 to vector<16x1xf32>
    %315 = arith.addf %311, %314 : vector<16x1xf32>
    %316 = math.rsqrt %315 : vector<16x1xf32>
    %317 = vector.broadcast %316 : vector<16x1xf32> to vector<16x32xf32>
    %318 = arith.mulf %313, %317 : vector<16x32xf32>
    %319 = vector.broadcast %12 : vector<1x32xf32> to vector<16x32xf32>
    %320 = arith.mulf %318, %319 : vector<16x32xf32>
    %321 = vector.broadcast %13 : vector<1x32xf32> to vector<16x32xf32>
    %322 = arith.addf %320, %321 : vector<16x32xf32>
    %c0_97 = arith.constant 0 : index
    %c0_98 = arith.constant 0 : index
    %323 = vector.load %arg6[%c0_97, %c0_98] : memref<16x32xf32, #tpu.memory_space<vmem>>, vector<16x32xf32>
    tpu.vector_store %arg6[%c0_97, %c0_98], %322 {strides = array<i32>} : memref<16x32xf32, #tpu.memory_space<vmem>>, vector<16x32xf32>,
    return
  }
}

</mosaic_0001>

<bundles_post_ra>
// kernel: transformer_encoder_ode.1
= control target key start
LH: loop header
LB: loop body
LE: loop exit
PB: predicated region body
PF: predicated region fallthrough
CT: control target
= control target key end

     0   :  { %11 = vsyncpa [#allocation3], 0  ;;  %s2312_s0 = inlined_call_operand.hbm [shape: f32[16,32], index: 0, kind: input, shape index: {}]   ;;  %s2313_s1 = inlined_call_operand.vmem [shape: f32[32,96], index: 1, kind: input, shape index: {}]   ;;  %s2314_s2 = inlined_call_operand.vmem [shape: f32[32,32], index: 2, kind: input, shape index: {}]   ;;  %s2315_s3 = inlined_call_operand.vmem [shape: f32[32,64], index: 3, kind: input, shape index: {}]   ;;  %s2316_s4 = inlined_call_operand.vmem [shape: f32[64,32], index: 4, kind: input, shape index: {}]   ;;  %s2317_s5 = inlined_call_operand.hbm [shape: f32[8,96], index: 5, kind: input, shape index: {}]   ;;  %s2318_s6 = inlined_call_operand.hbm [shape: f32[16,32], index: 6, kind: output, shape index: {}]  }
   0x1   :  { %12 = vsyncpa [#allocation6], 0 }
   0x2   :  { %13 = vsyncpa [#allocation4], 0  ;;  %s18_s23 = sshll.u32 %s2312_s0, 4  ;;  %s1737_s24 = smov [#allocation2]   ;;  %s19_s23 = int_to_ptr.hbm [resolvable:$true] %s18_s23 }
   0x3   :  { %s20_s25 = sshll.u32 %s1737_s24, 4  ;;  %s40_s28 = sshll.u32 %s2317_s5, 4  ;;  %s21_s25 = int_to_ptr.vmem [resolvable:$true] %s20_s25  ;;  %s41_s28 = int_to_ptr.hbm [resolvable:$true] %s40_s28 }
   0x4   :  { %s1738_s29 = smov 128   ;;  %s1739_s30 = smov 8  }
   0x5   :  { %26 = dma.hbm_to_vmem [thread:$0]  %s19_s23, 256, %s21_s25, [#allocation3], %s1738_s29, %s1738_s29, %s1739_s30  }
   0x6   :  { %s1740_s7 = smov [#allocation5]  }
   0x7   :  { %s42_s8 = sshll.u32 %s1740_s7, 4  ;;  %s43_s8 = int_to_ptr.vmem [resolvable:$true] %s42_s8 }
   0x8   :  { %45 = dma.hbm_to_vmem [thread:$0]  %s41_s28, 128, %s43_s8, [#allocation6]  }
   0x9   :  { %1731 = dma.done.wait [#allocation3], 256  }
   0xa   :  { %1732 = vsyncadd [#allocation3], 4294967040 }
   0xb   :  { %1733 = dma.done.wait [#allocation6], 128  }
   0xc   :  { %1734 = vsyncadd [#allocation6], 4294967168  ;;  %v1803_v0 = vld [vmem:[%s2313_s1 + $0x18] sm:$0xff]  ;;  %v1808_v1 = vld [vmem:[%s2313_s1 + $0x10] sm:$0xff]  ;;  %vm121_vm0 = vcmask 261120   ;;  %s1742_s15 = smov 88   ;;  %v77_v26 = vlaneseq }
   0xd   :  { %140 = vmatpush.msra.mxu0 %v1803_v0  ;;  %v1814_v2 = vld [vmem:[%s2313_s1 + $0x8] sm:$0xff]  ;;  %v1820_v3 = vld [vmem:[%s2313_s1] sm:$0xff]  ;;  %v1832_v6 = vld [vmem:[#allocation5] sm:$0xff]  ;;  %s1741_s1 = smov 120   ;;  %s1743_s16 = smov 96   ;;  %vm157_vm1 = vcmask 64512  }
   0xe   :  { %v1823_v4 = vld [vmem:[#allocation2] sm:$0xff]  ;;  %v1828_v5 = vld [vmem:[#allocation2 + $0x8] sm:$0xff]  ;;  %v1835_v7 = vperm.slane %v1832_v6, 0  ;;  %s1744_s17 = smov 104   ;;  %s1745_s18 = smov 72   ;;  %v78_v27 = vshrl.u32 %v77_v26, 7 }
   0xf   :  { %141 = vmatpush.msra.mxu0 %v1808_v1  ;;  %s1746_s19 = smov 80   ;;  %s1747_s20 = smov 112   ;;  %v81_v28 = vand.u32 127, %v77_v26  ;;  %vm193_vm3 = vcmask 130048   ;;  %vm579_vm5 = vcmask 195584   ;;  %vm704_vm13 = vcmask 523264  }
  0x10   :  { %v86_v29 = vand.u32 1, %v78_v27  ;;  %v79_v41 = vadd.s32 8, %v78_v27  ;;  %s1748_s21 = smov 64   ;;  %s1749_s22 = smov 40  }
  0x11   :  { %142 = vmatpush.msra.mxu0 %v1814_v2  ;;  %v110_v30 = vand.u32 1, %v81_v28  ;;  %s1750_s23 = smov 56   ;;  %s1751_s24 = smov 48  }
  0x12   :  { %v93_v46 = vand.u32 1, %v79_v41  ;;  %s1752_s25 = smov 24   ;;  %s1753_s26 = smov 16  }
  0x13   :  { %143 = vmatpush.msra.mxu0 %v1820_v3  ;;  %vm1889_vm2 = vcmp.eq.s32.totalorder %v86_v29, %v110_v30 }
  0x14   :  { %1454 = vmatmul.msk.f32.vlgmr.msra.gmra.mxu0 %vm121_vm0, %v1823_v4  ;;  %vm1902_vm4 = vcmp.eq.s32.totalorder %v93_v46, %v110_v30 }
  0x1c   :  { %1455 = vmatmul.msk.f32.gmra.mxu0 %vm121_vm0, %v1828_v5 }
  0x91   :  { %v145_v8 = vpop.f32.mrf.mxu0 }
  0x92   :  { %v1838_v9 = vadd.f32 %v145_v8, %v1835_v7 }
  0x94   :  { %251 = vrot.lane.b32.xlu2 %v1838_v9, %s1741_s1 }
  0x99   :  { %v148_v10 = vpop.f32.mrf.mxu0 }
  0x9a   :  { %v1843_v11 = vadd.f32 %v148_v10, %v1835_v7 }
  0x9c   :  { %257 = vrot.lane.b32.xlu1 %v1843_v11, %s1742_s15  ;;  %155 = vrot.lane.b32.xlu0 %v1843_v11, %s1743_s16 }
  0x9d   :  { %253 = vrot.lane.b32.xlu2 %v1843_v11, %s1741_s1 }
  0xa4   :  { %255 = vrot.lane.b32.xlu1 %v1838_v9, %s1742_s15  ;;  %153 = vrot.lane.b32.xlu0 %v1838_v9, %s1743_s16 }
  0xa5   :  { %451 = vrot.lane.b32.xlu2 %v1838_v9, %s1744_s17 }
  0xac   :  { %455 = vrot.lane.b32.xlu1 %v1838_v9, %s1745_s18  ;;  %457 = vrot.lane.b32.xlu0 %v1843_v11, %s1745_s18 }
  0xad   :  { %453 = vrot.lane.b32.xlu2 %v1843_v11, %s1744_s17 }
  0xb4   :  { %355 = vrot.lane.b32.xlu1 %v1838_v9, %s1746_s19  ;;  %357 = vrot.lane.b32.xlu0 %v1843_v11, %s1746_s19 }
  0xbc   :  { %353 = vrot.lane.b32.xlu1 %v1843_v11, %s1747_s20  ;;  %351 = vrot.lane.b32.xlu0 %v1838_v9, %s1747_s20 }
  0xee   :  { %v252_v14 = vpop.permute.xlu2 %251 }
  0xf7   :  { %v254_v17 = vpop.permute.xlu2 %253 }
  0xff   :  { %v452_v21 = vpop.permute.xlu2 %451 }
 0x107   :  { %v454_v24 = vpop.permute.xlu2 %453 }
 0x10e   :  { %v258_v12 = vpop.permute.xlu1 %257  ;;  %v156_v13 = vpop.permute.xlu0 %155 }
 0x10f   :  { %1456 = vmatpush.xpose.msk.msra.mxu1 %vm157_vm1, %v156_v13  ;;  %1462 = vmatpush.xpose.msk.msra.mxu3 %vm157_vm1, %v258_v12  ;;  %v1537_v13 = vpack.i.bf16 %v1838_v9, %v1843_v11 }
 0x116   :  { %v256_v15 = vpop.permute.xlu1 %255  ;;  %v154_v16 = vpop.permute.xlu0 %153 }
 0x117   :  { %1457 = vmatpush.xpose.msk.msra.mxu1 %vm157_vm1, %v154_v16  ;;  %1463 = vmatpush.xpose.msk.msra.mxu3 %vm157_vm1, %v256_v15 }
 0x11a   :  { %1458 = vmatmul.msk.f32.vlgmr.msra.gmra.mxu1 %vm157_vm1, %v1838_v9  ;;  %1464 = vmatmul.msk.f32.vlgmr.msra.gmra.mxu3 %vm157_vm1, %v252_v14 }
 0x11e   :  { %v458_v18 = vpop.permute.xlu0 %457  ;;  %v456_v19 = vpop.permute.xlu1 %455 }
 0x11f   :  { %1474 = vmatpush.xpose.msk.msrb.mxu3 %vm157_vm1, %v458_v18 }
 0x122   :  { %1459 = vmatmul.msk.f32.gmra.mxu1 %vm157_vm1, %v1843_v11  ;;  %1465 = vmatmul.msk.f32.gmra.mxu3 %vm157_vm1, %v254_v17 }
 0x123   :  { %1475 = vmatpush.xpose.msk.msrb.mxu3 %vm157_vm1, %v456_v19 }
 0x126   :  { %v358_v20 = vpop.permute.xlu0 %357  ;;  %v356_v22 = vpop.permute.xlu1 %355 }
 0x127   :  { %1468 = vmatpush.xpose.msk.msrb.mxu0 %vm157_vm1, %v358_v20 }
 0x12a   :  { %1476 = vmatmul.msk.f32.vlgmr.msrb.gmra.mxu3 %vm157_vm1, %v452_v21 }
 0x12b   :  { %1469 = vmatpush.xpose.msk.msrb.mxu0 %vm157_vm1, %v356_v22 }
 0x12e   :  { %v352_v23 = vpop.permute.xlu0 %351  ;;  %v354_v25 = vpop.permute.xlu1 %353 }
 0x12f   :  { %1470 = vmatmul.msk.f32.vlgmr.msrb.gmra.mxu0 %vm157_vm1, %v352_v23 }
 0x132   :  { %1477 = vmatmul.msk.f32.gmra.mxu3 %vm157_vm1, %v454_v24 }
 0x137   :  { %1471 = vmatmul.msk.f32.gmra.mxu0 %vm157_vm1, %v354_v25 }
 0x197   :  { %v183_v31 = vpop.f32.mrf.mxu1 }
 0x198   :  { %v189_v33 = vmul.f32 0.35355338, %v183_v31 }
 0x19a   :  { %v191_v34 = vsel %vm1889_vm2, %v189_v33, -1e+30 }
 0x19b   :  { %v194_v35 = vsel %vm193_vm3, %v191_v34, -inf }
 0x19c   :  { %195 = vmax.xlane.f32.xlu2 %v194_v35 }
 0x19d   :  { %v284_v36 = vpop.f32.mrf.mxu3 }
 0x19e   :  { %v290_v37 = vmul.f32 0.35355338, %v284_v36 }
 0x19f   :  { %v186_v45 = vpop.f32.mrf.mxu1 }
 0x1a0   :  { %v292_v38 = vsel %vm1889_vm2, %v290_v37, -1e+30  ;;  %v190_v49 = vmul.f32 0.35355338, %v186_v45 }
 0x1a1   :  { %v294_v39 = vsel %vm193_vm3, %v292_v38, -inf }
 0x1a2   :  { %295 = vmax.xlane.f32.xlu1 %v294_v39  ;;  %v192_v54 = vsel %vm1902_vm4, %v190_v49, -1e+30 }
 0x1a3   :  { %v197_v57 = vsel %vm193_vm3, %v192_v54, -inf }
 0x1a5   :  { %v287_v40 = vpop.f32.mrf.mxu3 }
 0x1a6   :  { %v291_v60 = vmul.f32 0.35355338, %v287_v40 }
 0x1a8   :  { %v293_v62 = vsel %vm1902_vm4, %v291_v60, -1e+30 }
 0x1a9   :  { %v297_v63 = vsel %vm193_vm3, %v293_v62, -inf }
 0x1ac   :  { %v384_v42 = vpop.f32.mrf.mxu0 }
 0x1ad   :  { %v390_v43 = vmul.f32 0.35355338, %v384_v42  ;;  %v484_v44 = vpop.f32.mrf.mxu3 }
 0x1ae   :  { %v490_v8 = vmul.f32 0.35355338, %v484_v44 }
 0x1af   :  { %v392_v47 = vsel %vm1889_vm2, %v390_v43, -1e+30 }
 0x1b0   :  { %v394_v48 = vsel %vm193_vm3, %v392_v47, -inf  ;;  %v492_v10 = vsel %vm1889_vm2, %v490_v8, -1e+30 }
 0x1b1   :  { %395 = vmax.xlane.f32.xlu0 %v394_v48  ;;  %v494_v12 = vsel %vm193_vm3, %v492_v10, -inf }
 0x1b4   :  { %v387_v51 = vpop.f32.mrf.mxu0 }
 0x1b5   :  { %v391_v52 = vmul.f32 0.35355338, %v387_v51  ;;  %v487_v53 = vpop.f32.mrf.mxu3 }
 0x1b6   :  { %v491_v55 = vmul.f32 0.35355338, %v487_v53 }
 0x1b7   :  { %v1910_v56 = vsel %vm1902_vm4, %v391_v52, -1e+30 }
 0x1b8   :  { %v397_v58 = vsel %vm193_vm3, %v1910_v56, -inf  ;;  %v1917_v59 = vsel %vm1902_vm4, %v491_v55, -1e+30 }
 0x1b9   :  { %198 = vmax.xlane.f32.xlu0 %v197_v57  ;;  %398 = vmax.xlane.f32.xlu2 %v397_v58  ;;  %v497_v61 = vsel %vm193_vm3, %v1917_v59, -inf }
 0x1ba   :  { %498 = vmax.xlane.f32.xlu1 %v497_v61 }
 0x1c1   :  { %298 = vmax.xlane.f32.xlu2 %v297_v63 }
 0x1c9   :  { %495 = vmax.xlane.f32.xlu2 %v494_v12 }
 0x1d3   :  { %1538 = vrot.lane.b32.xlu1 %v1537_v13, %s1748_s21 }
 0x20f   :  { %v196_v14 = vpop.xlane.xlu2 %195 }
 0x210   :  { %v200_v15 = vsub.f32 %v191_v34, %v196_v14 }
 0x212   :  { %v202_v16 = vmul.f32 1.442695, %v200_v15 }
 0x214   :  { %1577 = vpow2.f32 %v202_v16 }
 0x215   :  { %v296_v17 = vpop.xlane.xlu1 %295 }
 0x216   :  { %v300_v18 = vsub.f32 %v292_v38, %v296_v17 }
 0x218   :  { %v302_v19 = vmul.f32 1.442695, %v300_v18 }
 0x21a   :  { %v1578_v20 = vpop.eup %1577  ;;  %1579 = vpow2.f32 %v302_v19 }
 0x21b   :  { %v206_v21 = vsel %vm193_vm3, %v1578_v20, 0.0 }
 0x21c   :  { %207 = vadd.xlane.f32.xlu0 %v206_v21 }
 0x220   :  { %v1931_v22 = vpop.eup %1579 }
 0x221   :  { %v306_v9 = vsel %vm193_vm3, %v1931_v22, 0.0 }
 0x224   :  { %307 = vadd.xlane.f32.xlu0 %v306_v9  ;;  %v396_v11 = vpop.xlane.xlu0 %395 }
 0x225   :  { %v400_v23 = vsub.f32 %v392_v47, %v396_v11 }
 0x227   :  { %v402_v24 = vmul.f32 1.442695, %v400_v23 }
 0x229   :  { %1581 = vpow2.f32 %v402_v24 }
 0x22c   :  { %v199_v25 = vpop.xlane.xlu0 %198  ;;  %v399_v34 = vpop.xlane.xlu2 %398 }
 0x22d   :  { %v201_v26 = vsub.f32 %v192_v54, %v199_v25  ;;  %v499_v33 = vpop.xlane.xlu1 %498  ;;  %v401_v55 = vsub.f32 %v1910_v56, %v399_v34 }
 0x22e   :  { %v501_v47 = vsub.f32 %v1917_v59, %v499_v33 }
 0x22f   :  { %v1935_v27 = vpop.eup %1581  ;;  %v204_v28 = vmul.f32 1.442695, %v201_v26  ;;  %v404_v58 = vmul.f32 1.442695, %v401_v55 }
 0x230   :  { %v406_v29 = vsel %vm193_vm3, %v1935_v27, 0.0  ;;  %v504_v49 = vmul.f32 1.442695, %v501_v47 }
 0x231   :  { %1583 = vpow2.f32 %v204_v28  ;;  %407 = vadd.xlane.f32.xlu1 %v406_v29 }
 0x234   :  { %v299_v38 = vpop.xlane.xlu2 %298 }
 0x235   :  { %v301_v39 = vsub.f32 %v293_v62, %v299_v38 }
 0x237   :  { %v1584_v30 = vpop.eup %1583  ;;  %v304_v40 = vmul.f32 1.442695, %v301_v39  ;;  %v1972_v39 = vld [vmem:[%s2314_s2 + $0x18] sm:$0xff] }
 0x238   :  { %1548 = vrot.lane.b32.xlu0 %v1537_v13, %s1749_s22  ;;  %v209_v31 = vsel %vm193_vm3, %v1584_v30, 0.0  ;;  %601 = vmatpush.msra.mxu0 %v1972_v39 }
 0x239   :  { %210 = vadd.xlane.f32.xlu2 %v209_v31  ;;  %1585 = vpow2.f32 %v304_v40  ;;  %v1977_v40 = vld [vmem:[%s2314_s2 + $0x10] sm:$0xff] }
 0x23a   :  { %602 = vmatpush.msra.mxu0 %v1977_v40 }
 0x23c   :  { %v496_v41 = vpop.xlane.xlu2 %495 }
 0x23d   :  { %v500_v42 = vsub.f32 %v492_v10, %v496_v41  ;;  %v1983_v41 = vld [vmem:[%s2314_s2 + $0x8] sm:$0xff] }
 0x23e   :  { %603 = vmatpush.msra.mxu0 %v1983_v41 }
 0x23f   :  { %v502_v43 = vmul.f32 1.442695, %v500_v42  ;;  %v1586_v44 = vpop.eup %1585  ;;  %v1990_v42 = vld [vmem:[%s2314_s2] sm:$0xff] }
 0x240   :  { %v309_v45 = vsel %vm193_vm3, %v1586_v44, 0.0  ;;  %604 = vmatpush.msra.mxu0 %v1990_v42 }
 0x241   :  { %1587 = vpow2.f32 %v502_v43 }
 0x242   :  { %1589 = vpow2.f32 %v504_v49 }
 0x245   :  { %v1539_v35 = vpop.permute.xlu1 %1538 }
 0x246   :  { %v1540_v36 = vunpack.i.l.bf16 %v1539_v35  ;;  %v1541_v37 = vunpack.i.h.bf16 %v1539_v35 }
 0x247   :  { %v1588_v46 = vpop.eup %1587 }
 0x248   :  { %242 = vmatpush.msra.mxu2 %v1540_v36  ;;  %v506_v48 = vsel %vm193_vm3, %v1588_v46, 0.0  ;;  %v1590_v51 = vpop.eup %1589 }
 0x249   :  { %v509_v52 = vsel %vm193_vm3, %v1590_v51, 0.0 }
 0x24a   :  { %243 = vmatpush.msra.mxu2 %v1541_v37 }
 0x251   :  { %1543 = vrot.lane.b32.xlu2 %v1537_v13, %s1750_s23 }
 0x262   :  { %310 = vadd.xlane.f32.xlu0 %v309_v45 }
 0x26a   :  { %507 = vadd.xlane.f32.xlu0 %v506_v48 }
 0x27a   :  { %510 = vadd.xlane.f32.xlu2 %v509_v52 }
 0x27e   :  { %1553 = vrot.lane.b32.xlu0 %v1537_v13, %s1751_s24 }
 0x28f   :  { %v208_v53 = vpop.xlane.xlu0 %207 }
 0x290   :  { %1591 = vrcp.f32 %v208_v53 }
 0x291   :  { %1593 = vpow2.f32 %v404_v58 }
 0x296   :  { %v1592_v54 = vpop.eup %1591 }
 0x297   :  { %v214_v57 = vmul.f32 %v1592_v54, %v1578_v20  ;;  %v1594_v59 = vpop.eup %1593  ;;  %v308_v62 = vpop.xlane.xlu0 %307 }
 0x298   :  { %v409_v60 = vsel %vm193_vm3, %v1594_v59, 0.0 }
 0x299   :  { %1460 = vmatmul.msk.f32.vlgmr.msra.gmra.mxu2 %vm193_vm3, %v214_v57  ;;  %v2002_v57 = vperm.slane %v1832_v6, 1 }
 0x2a4   :  { %v408_v11 = vpop.xlane.xlu1 %407 }
 0x2a8   :  { %410 = vadd.xlane.f32.xlu0 %v409_v60 }
 0x2aa   :  { %v1549_v12 = vpop.permute.xlu0 %1548 }
 0x2ab   :  { %v1550_v14 = vunpack.i.l.bf16 %v1549_v12  ;;  %v1551_v16 = vunpack.i.h.bf16 %v1549_v12  ;;  %v1754_v12 = vmov 32.0  }
 0x2ac   :  { %v211_v61 = vpop.xlane.xlu2 %210 }
 0x2ad   :  { %1595 = vrcp.f32 %v211_v61 }
 0x2ae   :  { %1597 = vrcp.f32 %v308_v62 }
 0x2b3   :  { %v1596_v63 = vpop.eup %1595 }
 0x2b4   :  { %v1544_v8 = vpop.permute.xlu2 %1543  ;;  %v215_v10 = vmul.f32 %v1596_v63, %v1584_v30  ;;  %v1598_v15 = vpop.eup %1597 }
 0x2b5   :  { %v1545_v13 = vunpack.i.l.bf16 %v1544_v8  ;;  %v1546_v56 = vunpack.i.h.bf16 %v1544_v8  ;;  %v314_v17 = vmul.f32 %v1598_v15, %v1931_v22 }
 0x2b6   :  { %1461 = vmatmul.msk.f32.gmra.mxu2 %vm193_vm3, %v215_v10 }
 0x2b7   :  { %342 = vmatpush.msrb.mxu2 %v1545_v13 }
 0x2b9   :  { %343 = vmatpush.msrb.mxu2 %v1546_v56 }
 0x2bb   :  { %542 = vmatpush.msra.mxu2 %v1550_v14 }
 0x2bd   :  { %543 = vmatpush.msra.mxu2 %v1551_v16 }
 0x2be   :  { %1466 = vmatmul.msk.f32.vlgmr.msrb.gmra.mxu2 %vm193_vm3, %v314_v17 }
 0x2bf   :  { %804 = vmatpush.msrb.mxu2 %v1803_v0 }
 0x2c1   :  { %805 = vmatpush.msrb.mxu2 %v1808_v1 }
 0x2c3   :  { %806 = vmatpush.msrb.mxu2 %v1814_v2 }
 0x2c5   :  { %807 = vmatpush.msrb.mxu2 %v1820_v3 }
 0x2d5   :  { %v311_v18 = vpop.xlane.xlu0 %310 }
 0x2d6   :  { %1599 = vrcp.f32 %v311_v18 }
 0x2dc   :  { %v1600_v19 = vpop.eup %1599 }
 0x2dd   :  { %v508_v20 = vpop.xlane.xlu0 %507  ;;  %v315_v21 = vmul.f32 %v1600_v19, %v1586_v44 }
 0x2de   :  { %1601 = vrcp.f32 %v508_v20 }
 0x2df   :  { %1467 = vmatmul.msk.f32.gmra.mxu2 %vm193_vm3, %v315_v21  ;;  %1603 = vrcp.f32 %v408_v11 }
 0x2e4   :  { %v1602_v9 = vpop.eup %1601 }
 0x2e5   :  { %v514_v22 = vmul.f32 %v1602_v9, %v1588_v46  ;;  %v1604_v2 = vpop.eup %1603 }
 0x2e6   :  { %v414_v25 = vmul.f32 %v1604_v2, %v1935_v27  ;;  %v2025_v2 = vld [vmem:[%s2315_s3 + $0x10] sm:$0xff] }
 0x2e7   :  { %1478 = vmatmul.msk.f32.vlgmr.msra.gmra.mxu2 %vm193_vm3, %v514_v22 }
 0x2ed   :  { %v511_v0 = vpop.xlane.xlu2 %510 }
 0x2ee   :  { %1605 = vrcp.f32 %v511_v0 }
 0x2f0   :  { %v1554_v1 = vpop.permute.xlu0 %1553 }
 0x2f1   :  { %v1555_v23 = vunpack.i.l.bf16 %v1554_v1  ;;  %v1556_v3 = vunpack.i.h.bf16 %v1554_v1  ;;  %v2019_v1 = vld [vmem:[%s2315_s3 + $0x18] sm:$0xff] }
 0x2f3   :  { %442 = vmatpush.msrb.mxu1 %v1555_v23  ;;  %v2031_v23 = vld [vmem:[%s2315_s3 + $0x8] sm:$0xff] }
 0x2f4   :  { %v1606_v24 = vpop.eup %1605 }
 0x2f5   :  { %443 = vmatpush.msrb.mxu1 %v1556_v3  ;;  %v515_v26 = vmul.f32 %v1606_v24, %v1590_v51  ;;  %v2036_v3 = vld [vmem:[%s2315_s3] sm:$0xff] }
 0x2f6   :  { %1472 = vmatmul.msk.f32.vlgmr.msrb.gmra.mxu1 %vm193_vm3, %v414_v25 }
 0x2f7   :  { %1479 = vmatmul.msk.f32.gmra.mxu2 %vm193_vm3, %v515_v26  ;;  %690 = vmatpush.msra.mxu1 %v2019_v1 }
 0x2f9   :  { %691 = vmatpush.msra.mxu1 %v2025_v2 }
 0x2fb   :  { %692 = vmatpush.msra.mxu1 %v2031_v23 }
 0x2fd   :  { %693 = vmatpush.msra.mxu1 %v2036_v3 }
 0x31b   :  { %v411_v28 = vpop.xlane.xlu0 %410 }
 0x31c   :  { %1607 = vrcp.f32 %v411_v28  ;;  %v245_v31 = vpop.f32.mrf.mxu2 }
 0x31d   :  { %1609 = vrcp.f32 %v1754_v12  ;;  %v2093_v12 = vld [vmem:[%s2316_s4 + $0x8] sm:$0xff] }
 0x322   :  { %v1608_v29 = vpop.eup %1607 }
 0x323   :  { %v415_v30 = vmul.f32 %v1608_v29, %v1594_v59  ;;  %v1610_v13 = vpop.eup %1609 }
 0x324   :  { %v621_v56 = vmul.f32 32.0, %v1610_v13  ;;  %vm625_vm6 = vweird.f32 %v1610_v13 }
 0x325   :  { %1473 = vmatmul.msk.f32.gmra.mxu1 %vm193_vm3, %v415_v30 }
 0x326   :  { %v622_v14 = vsub.f32 1.0, %v621_v56  ;;  %v2103_v56 = vperm.slane %v1832_v6, 4 }
 0x328   :  { %v623_v15 = vmul.f32 %v1610_v13, %v622_v14 }
 0x32a   :  { %v624_v16 = vadd.f32 %v1610_v13, %v623_v15 }
 0x339   :  { %v248_v33 = vpop.f32.mrf.mxu2 }
 0x341   :  { %v345_v34 = vpop.f32.mrf.mxu2 }
 0x342   :  { %553 = vrot.lane.b32.xlu1 %v345_v34, %s1739_s30 }
 0x362   :  { %v348_v35 = vpop.f32.mrf.mxu2 }
 0x36a   :  { %v545_v36 = vpop.f32.mrf.mxu2 }
 0x36b   :  { %569 = vrot.lane.b32.xlu1 %v545_v36, %s1752_s25 }
 0x373   :  { %v445_v27 = vpop.f32.mrf.mxu1  ;;  %555 = vrot.lane.b32.xlu1 %v348_v35, %s1739_s30  ;;  %v2042_v35 = vperm.slane %v1832_v6, 2 }
 0x374   :  { %561 = vrot.lane.b32.xlu2 %v445_v27, %s1753_s26 }
 0x37a   :  { %v548_v37 = vpop.f32.mrf.mxu2 }
 0x37c   :  { %571 = vrot.lane.b32.xlu2 %v548_v37, %s1752_s25  ;;  %v2045_v37 = vperm.slane %v1832_v6, 3 }
 0x3a2   :  { %v448_v38 = vpop.f32.mrf.mxu1 }
 0x3a3   :  { %563 = vrot.lane.b32.xlu0 %v448_v38, %s1753_s26 }
 0x3b4   :  { %v554_v43 = vpop.permute.xlu1 %553 }
 0x3b5   :  { %v575_v45 = vsel %vm157_vm1, %v245_v31, %v554_v43 }
 0x3ce   :  { %v562_v44 = vpop.permute.xlu2 %561 }
 0x3cf   :  { %v577_v46 = vsel %vm193_vm3, %v575_v45, %v562_v44  ;;  %v2053_v44 = vld [vmem:[%s2316_s4 + $0x38] sm:$0xff]  ;;  %v2058_v45 = vld [vmem:[%s2316_s4 + $0x30] sm:$0xff] }
 0x3d0   :  { %719 = vmatpush.msra.mxu3 %v2053_v44 }
 0x3d2   :  { %720 = vmatpush.msra.mxu3 %v2058_v45 }
 0x3d6   :  { %v572_v53 = vpop.permute.xlu2 %571 }
 0x3dd   :  { %v570_v47 = vpop.permute.xlu1 %569 }
 0x3de   :  { %v580_v48 = vsel %vm579_vm5, %v577_v46, %v570_v47  ;;  %v2064_v46 = vld [vmem:[%s2316_s4 + $0x28] sm:$0xff] }
 0x3df   :  { %1480 = vmatmul.msk.f32.vlgmr.msra.gmra.mxu0 %vm121_vm0, %v580_v48  ;;  %721 = vmatpush.msra.mxu3 %v2064_v46 }
 0x3e5   :  { %v556_v49 = vpop.permute.xlu1 %555 }
 0x3e6   :  { %v576_v51 = vsel %vm157_vm1, %v248_v33, %v556_v49  ;;  %v2071_v49 = vld [vmem:[%s2316_s4 + $0x20] sm:$0xff] }
 0x3e7   :  { %722 = vmatpush.msra.mxu3 %v2071_v49 }
 0x415   :  { %v564_v52 = vpop.permute.xlu0 %563 }
 0x416   :  { %v578_v54 = vsel %vm193_vm3, %v576_v51, %v564_v52  ;;  %v2077_v52 = vld [vmem:[%s2316_s4 + $0x18] sm:$0xff] }
 0x417   :  { %v581_v55 = vsel %vm579_vm5, %v578_v54, %v572_v53  ;;  %723 = vmatpush.msra.mxu3 %v2077_v52 }
 0x418   :  { %1481 = vmatmul.msk.f32.gmra.mxu0 %vm121_vm0, %v581_v55 }
 0x45c   :  { %v606_v58 = vpop.f32.mrf.mxu0 }
 0x45d   :  { %v607_v59 = vadd.f32 %v606_v58, %v2002_v57 }
 0x45f   :  { %v612_v60 = vadd.f32 %v607_v59, %v1823_v4  ;;  %v2010_v4 = vsel %vm625_vm6, %v1610_v13, %v624_v16  ;;  %v2099_v13 = vld [vmem:[%s2316_s4] sm:$0xff] }
 0x461   :  { %v614_v61 = vsel %vm121_vm0, %v612_v60, 0.0 }
 0x462   :  { %615 = vadd.xlane.f32.xlu1 %v614_v61 }
 0x495   :  { %v609_v62 = vpop.f32.mrf.mxu0 }
 0x496   :  { %v610_v63 = vadd.f32 %v609_v62, %v2002_v57 }
 0x498   :  { %v613_v8 = vadd.f32 %v610_v63, %v1828_v5 }
 0x49a   :  { %v617_v10 = vsel %vm121_vm0, %v613_v8, 0.0 }
 0x49b   :  { %618 = vadd.xlane.f32.xlu2 %v617_v10  ;;  %v2087_v10 = vld [vmem:[%s2316_s4 + $0x10] sm:$0xff]  ;;  %s1755_s4 = smov [#allocation7]  }
 0x49c   :  { %724 = vmatpush.msra.mxu3 %v2087_v10 }
 0x49e   :  { %725 = vmatpush.msra.mxu3 %v2093_v12 }
 0x4a0   :  { %726 = vmatpush.msra.mxu3 %v2099_v13 }
 0x4d5   :  { %v616_v17 = vpop.xlane.xlu1 %615 }
 0x4d6   :  { %v627_v18 = vmul.f32 %v2010_v4, %v616_v17 }
 0x4d8   :  { %v629_v19 = vsub.f32 %v612_v60, %v627_v18 }
 0x4da   :  { %v631_v20 = vmul.f32 %v629_v19, %v629_v19 }
 0x4dc   :  { %v633_v5 = vsel %vm121_vm0, %v631_v20, 0.0  ;;  %v2110_v20 = vperm.slane %v1832_v6, 5 }
 0x4dd   :  { %634 = vadd.xlane.f32.xlu0 %v633_v5 }
 0x50e   :  { %v619_v21 = vpop.xlane.xlu2 %618 }
 0x50f   :  { %v628_v9 = vmul.f32 %v2010_v4, %v619_v21 }
 0x511   :  { %v630_v22 = vsub.f32 %v613_v8, %v628_v9 }
 0x513   :  { %v632_v11 = vmul.f32 %v630_v22, %v630_v22 }
 0x515   :  { %v636_v0 = vsel %vm121_vm0, %v632_v11, 0.0 }
 0x516   :  { %637 = vadd.xlane.f32.xlu1 %v636_v0 }
 0x550   :  { %v635_v24 = vpop.xlane.xlu0 %634 }
 0x551   :  { %v639_v25 = vmul.f32 %v635_v24, %v2010_v4 }
 0x553   :  { %v641_v26 = vadd.f32 1e-05, %v639_v25 }
 0x555   :  { %1611 = vrsqrt.f32 %v641_v26  ;;  %vm649_vm8 = vweird.f32 %v641_v26 }
 0x55b   :  { %v1612_v28 = vpop.eup %1611 }
 0x55c   :  { %v644_v29 = vmul.f32 %v1612_v28, %v641_v26  ;;  %vm650_vm7 = vweird.f32 %v1612_v28 }
 0x55d   :  { %vm651_vm9 = vmor %vm649_vm8, %vm650_vm7 }
 0x55e   :  { %v645_v30 = vmul.f32 %v1612_v28, %v644_v29 }
 0x560   :  { %v646_v31 = vmul.f32 0.5, %v645_v30 }
 0x562   :  { %v647_v33 = vsub.f32 1.5, %v646_v31 }
 0x564   :  { %v648_v34 = vmul.f32 %v1612_v28, %v647_v33 }
 0x566   :  { %v652_v36 = vsel %vm651_vm9, %v1612_v28, %v648_v34 }
 0x567   :  { %v663_v27 = vmul.f32 %v652_v36, %v629_v19 }
 0x569   :  { %v666_v38 = vmul.f32 %v2042_v35, %v663_v27 }
 0x56b   :  { %v669_v43 = vadd.f32 %v2045_v37, %v666_v38 }
 0x56d   :  { %1482 = vmatmul.msk.f32.vlgmr.msra.gmra.mxu1 %vm121_vm0, %v669_v43 }
 0x589   :  { %v638_v47 = vpop.xlane.xlu1 %637 }
 0x58a   :  { %v640_v48 = vmul.f32 %v638_v47, %v2010_v4 }
 0x58c   :  { %v642_v51 = vadd.f32 1e-05, %v640_v48 }
 0x58e   :  { %1613 = vrsqrt.f32 %v642_v51  ;;  %vm659_vm11 = vweird.f32 %v642_v51 }
 0x594   :  { %v1614_v53 = vpop.eup %1613 }
 0x595   :  { %v654_v54 = vmul.f32 %v1614_v53, %v642_v51  ;;  %vm660_vm10 = vweird.f32 %v1614_v53 }
 0x596   :  { %vm661_vm12 = vmor %vm659_vm11, %vm660_vm10 }
 0x597   :  { %v655_v55 = vmul.f32 %v1614_v53, %v654_v54 }
 0x599   :  { %v656_v58 = vmul.f32 0.5, %v655_v55 }
 0x59b   :  { %v657_v59 = vsub.f32 1.5, %v656_v58 }
 0x59d   :  { %v658_v60 = vmul.f32 %v1614_v53, %v657_v59 }
 0x59f   :  { %v662_v61 = vsel %vm661_vm12, %v1614_v53, %v658_v60  ;;  %v2122_v60 = vperm.slane %v1832_v6, 6 }
 0x5a0   :  { %v664_v62 = vmul.f32 %v662_v61, %v630_v22 }
 0x5a2   :  { %v667_v63 = vmul.f32 %v2042_v35, %v664_v62 }
 0x5a4   :  { %v670_v8 = vadd.f32 %v2045_v37, %v667_v63  ;;  %v2125_v63 = vperm.slane %v1832_v6, 7 }
 0x5a6   :  { %1483 = vmatmul.msk.f32.gmra.mxu1 %vm121_vm0, %v670_v8 }
 0x5ea   :  { %v695_v14 = vpop.f32.mrf.mxu1 }
 0x5eb   :  { %v696_v15 = vadd.f32 %v695_v14, %v2103_v56 }
 0x5ed   :  { %v701_v16 = vmax.f32 %v696_v15, 0.0 }
 0x5ef   :  { %1484 = vmatmul.msk.f32.vlgmr.msra.gmra.mxu3 %vm704_vm13, %v701_v16 }
 0x623   :  { %v698_v17 = vpop.f32.mrf.mxu1 }
 0x624   :  { %v699_v18 = vadd.f32 %v698_v17, %v2103_v56 }
 0x626   :  { %v702_v19 = vmax.f32 %v699_v18, 0.0 }
 0x628   :  { %1485 = vmatmul.msk.f32.gmra.mxu3 %vm704_vm13, %v702_v19 }
 0x672   :  { %v728_v5 = vpop.f32.mrf.mxu3 }
 0x673   :  { %v729_v21 = vadd.f32 %v728_v5, %v2110_v20 }
 0x675   :  { %v734_v9 = vadd.f32 %v729_v21, %v669_v43 }
 0x677   :  { %v736_v22 = vsel %vm121_vm0, %v734_v9, 0.0 }
 0x678   :  { %737 = vadd.xlane.f32.xlu2 %v736_v22 }
 0x6ab   :  { %v731_v11 = vpop.f32.mrf.mxu3 }
 0x6ac   :  { %v732_v0 = vadd.f32 %v731_v11, %v2110_v20 }
 0x6ae   :  { %v735_v24 = vadd.f32 %v732_v0, %v670_v8 }
 0x6b0   :  { %v739_v25 = vsel %vm121_vm0, %v735_v24, 0.0 }
 0x6b1   :  { %740 = vadd.xlane.f32.xlu1 %v739_v25 }
 0x6eb   :  { %v738_v26 = vpop.xlane.xlu2 %737 }
 0x6ec   :  { %v742_v28 = vmul.f32 %v738_v26, %v2010_v4 }
 0x6ee   :  { %v744_v29 = vsub.f32 %v734_v9, %v742_v28 }
 0x6f0   :  { %v746_v30 = vmul.f32 %v744_v29, %v744_v29 }
 0x6f2   :  { %v748_v31 = vsel %vm121_vm0, %v746_v30, 0.0 }
 0x6f3   :  { %749 = vadd.xlane.f32.xlu2 %v748_v31 }
 0x724   :  { %v741_v33 = vpop.xlane.xlu1 %740 }
 0x725   :  { %v743_v34 = vmul.f32 %v741_v33, %v2010_v4 }
 0x727   :  { %v745_v36 = vsub.f32 %v735_v24, %v743_v34 }
 0x729   :  { %v747_v27 = vmul.f32 %v745_v36, %v745_v36 }
 0x72b   :  { %v751_v38 = vsel %vm121_vm0, %v747_v27, 0.0 }
 0x72c   :  { %752 = vadd.xlane.f32.xlu0 %v751_v38 }
 0x766   :  { %v750_v43 = vpop.xlane.xlu2 %749 }
 0x767   :  { %v754_v47 = vmul.f32 %v750_v43, %v2010_v4 }
 0x769   :  { %v756_v48 = vadd.f32 1e-05, %v754_v47 }
 0x76b   :  { %1615 = vrsqrt.f32 %v756_v48  ;;  %vm764_vm15 = vweird.f32 %v756_v48 }
 0x771   :  { %v1616_v51 = vpop.eup %1615 }
 0x772   :  { %v759_v53 = vmul.f32 %v1616_v51, %v756_v48  ;;  %vm765_vm14 = vweird.f32 %v1616_v51 }
 0x773   :  { %vm766_vm6 = vmor %vm764_vm15, %vm765_vm14 }
 0x774   :  { %v760_v54 = vmul.f32 %v1616_v51, %v759_v53 }
 0x776   :  { %v761_v55 = vmul.f32 0.5, %v760_v54 }
 0x778   :  { %v762_v58 = vsub.f32 1.5, %v761_v55 }
 0x77a   :  { %v763_v59 = vmul.f32 %v1616_v51, %v762_v58 }
 0x77c   :  { %v767_v61 = vsel %vm766_vm6, %v1616_v51, %v763_v59 }
 0x77d   :  { %v778_v62 = vmul.f32 %v767_v61, %v744_v29 }
 0x77f   :  { %v781_v8 = vmul.f32 %v2122_v60, %v778_v62 }
 0x781   :  { %v2129_v14 = vadd.f32 %v2125_v63, %v781_v8 }
 0x783   :  { %1486 = vmatmul.msk.f32.vlgmr.msrb.gmra.mxu2 %vm121_vm0, %v2129_v14 }
 0x79f   :  { %v753_v15 = vpop.xlane.xlu0 %752 }
 0x7a0   :  { %v755_v16 = vmul.f32 %v753_v15, %v2010_v4 }
 0x7a2   :  { %v757_v17 = vadd.f32 1e-05, %v755_v16 }
 0x7a4   :  { %1617 = vrsqrt.f32 %v757_v17  ;;  %vm774_vm8 = vweird.f32 %v757_v17 }
 0x7aa   :  { %v1618_v18 = vpop.eup %1617 }
 0x7ab   :  { %v769_v19 = vmul.f32 %v1618_v18, %v757_v17  ;;  %vm775_vm7 = vweird.f32 %v1618_v18 }
 0x7ac   :  { %vm776_vm9 = vmor %vm774_vm8, %vm775_vm7 }
 0x7ad   :  { %v770_v5 = vmul.f32 %v1618_v18, %v769_v19 }
 0x7af   :  { %v771_v21 = vmul.f32 0.5, %v770_v5 }
 0x7b1   :  { %v772_v9 = vsub.f32 1.5, %v771_v21 }
 0x7b3   :  { %v773_v6 = vmul.f32 %v1618_v18, %v772_v9 }
 0x7b5   :  { %v777_v22 = vsel %vm776_vm9, %v1618_v18, %v773_v6 }
 0x7b6   :  { %v779_v11 = vmul.f32 %v777_v22, %v745_v36 }
 0x7b8   :  { %v782_v0 = vmul.f32 %v2122_v60, %v779_v11 }
 0x7ba   :  { %v2136_v24 = vadd.f32 %v2125_v63, %v782_v0 }
 0x7bc   :  { %1487 = vmatmul.msk.f32.gmra.mxu2 %vm121_vm0, %v2136_v24 }
 0x806   :  { %v809_v25 = vpop.f32.mrf.mxu2 }
 0x807   :  { %v810_v26 = vadd.f32 %v809_v25, %v1835_v7 }
 0x809   :  { %913 = vrot.lane.b32.xlu0 %v810_v26, %s1741_s1  ;;  %917 = vrot.lane.b32.xlu2 %v810_v26, %s1742_s15 }
 0x811   :  { %817 = vrot.lane.b32.xlu0 %v810_v26, %s1743_s16 }
 0x819   :  { %1117 = vrot.lane.b32.xlu0 %v810_v26, %s1745_s18 }
 0x821   :  { %1017 = vrot.lane.b32.xlu0 %v810_v26, %s1746_s19 }
 0x83f   :  { %v812_v28 = vpop.f32.mrf.mxu2 }
 0x840   :  { %v813_v29 = vadd.f32 %v812_v28, %v1835_v7 }
 0x842   :  { %919 = vrot.lane.b32.xlu1 %v813_v29, %s1742_s15  ;;  %1015 = vrot.lane.b32.xlu0 %v813_v29, %s1747_s20  ;;  %v2156_v30 = vpack.i.bf16 %v810_v26, %v813_v29 }
 0x843   :  { %915 = vrot.lane.b32.xlu2 %v813_v29, %s1741_s1  ;;  %s1438_s1 = sshll.u32 %s1755_s4, 4  ;;  %s1439_s1 = int_to_ptr.vmem [resolvable:$true] %s1438_s1 }
 0x84a   :  { %819 = vrot.lane.b32.xlu1 %v813_v29, %s1743_s16 }
 0x84b   :  { %1113 = vrot.lane.b32.xlu2 %v810_v26, %s1744_s17 }
 0x852   :  { %1119 = vrot.lane.b32.xlu1 %v813_v29, %s1745_s18 }
 0x853   :  { %1115 = vrot.lane.b32.xlu2 %v813_v29, %s1744_s17  ;;  %s1440_s17 = sshll.u32 %s2318_s6, 4  ;;  %s1441_s17 = int_to_ptr.hbm [resolvable:$true] %s1440_s17 }
 0x85a   :  { %1019 = vrot.lane.b32.xlu1 %v813_v29, %s1746_s19 }
 0x862   :  { %1013 = vrot.lane.b32.xlu1 %v810_v26, %s1747_s20 }
 0x863   :  { %v918_v33 = vpop.permute.xlu2 %917 }
 0x86a   :  { %1558 = vrot.lane.b32.xlu1 %v2156_v30, %s1750_s23 }
 0x87b   :  { %v914_v7 = vpop.permute.xlu0 %913 }
 0x883   :  { %v818_v34 = vpop.permute.xlu0 %817 }
 0x88b   :  { %v1118_v43 = vpop.permute.xlu0 %1117 }
 0x893   :  { %v1018_v51 = vpop.permute.xlu0 %1017 }
 0x89d   :  { %v916_v27 = vpop.permute.xlu2 %915 }
 0x8a5   :  { %v1114_v47 = vpop.permute.xlu2 %1113 }
 0x8ad   :  { %v1116_v53 = vpop.permute.xlu2 %1115 }
 0x8b4   :  { %v920_v31 = vpop.permute.xlu1 %919 }
 0x8b5   :  { %1494 = vmatpush.xpose.msk.msrb.mxu3 %vm157_vm1, %v920_v31 }
 0x8b9   :  { %1495 = vmatpush.xpose.msk.msrb.mxu3 %vm157_vm1, %v918_v33 }
 0x8bc   :  { %v820_v36 = vpop.permute.xlu1 %819  ;;  %1496 = vmatmul.msk.f32.vlgmr.msrb.gmra.mxu3 %vm157_vm1, %v914_v7 }
 0x8bd   :  { %1488 = vmatpush.xpose.msk.msrb.mxu0 %vm157_vm1, %v820_v36 }
 0x8c1   :  { %1489 = vmatpush.xpose.msk.msrb.mxu0 %vm157_vm1, %v818_v34 }
 0x8c4   :  { %v1120_v38 = vpop.permute.xlu1 %1119  ;;  %1490 = vmatmul.msk.f32.vlgmr.msrb.gmra.mxu0 %vm157_vm1, %v810_v26  ;;  %1497 = vmatmul.msk.f32.gmra.mxu3 %vm157_vm1, %v916_v27 }
 0x8c5   :  { %1506 = vmatpush.xpose.msk.msra.mxu3 %vm157_vm1, %v1120_v38 }
 0x8c9   :  { %1507 = vmatpush.xpose.msk.msra.mxu3 %vm157_vm1, %v1118_v43 }
 0x8cc   :  { %v1020_v48 = vpop.permute.xlu1 %1019  ;;  %1491 = vmatmul.msk.f32.gmra.mxu0 %vm157_vm1, %v813_v29  ;;  %1508 = vmatmul.msk.f32.vlgmr.msra.gmra.mxu3 %vm157_vm1, %v1114_v47 }
 0x8cd   :  { %1367 = vmatpush.msrb.mxu3 %v2053_v44  ;;  %1500 = vmatpush.xpose.msk.msra.mxu0 %vm157_vm1, %v1020_v48 }
 0x8cf   :  { %1368 = vmatpush.msrb.mxu3 %v2058_v45 }
 0x8d1   :  { %1369 = vmatpush.msrb.mxu3 %v2064_v46  ;;  %1501 = vmatpush.xpose.msk.msra.mxu0 %vm157_vm1, %v1018_v51 }
 0x8d3   :  { %1370 = vmatpush.msrb.mxu3 %v2071_v49 }
 0x8d4   :  { %v1014_v44 = vpop.permute.xlu1 %1013  ;;  %1509 = vmatmul.msk.f32.gmra.mxu3 %vm157_vm1, %v1116_v53 }
 0x8d5   :  { %1261 = vmatpush.msrb.mxu0 %v1972_v39  ;;  %1371 = vmatpush.msrb.mxu3 %v2077_v52  ;;  %v1016_v39 = vpop.permute.xlu0 %1015 }
 0x8d6   :  { %1502 = vmatmul.msk.f32.vlgmr.msra.gmra.mxu0 %vm157_vm1, %v1014_v44 }
 0x8d7   :  { %1262 = vmatpush.msrb.mxu0 %v1977_v40  ;;  %1372 = vmatpush.msrb.mxu3 %v2087_v10 }
 0x8d9   :  { %1263 = vmatpush.msrb.mxu0 %v1983_v41  ;;  %1373 = vmatpush.msrb.mxu3 %v2093_v12 }
 0x8db   :  { %1264 = vmatpush.msrb.mxu0 %v1990_v42  ;;  %1374 = vmatpush.msrb.mxu3 %v2099_v13 }
 0x8dc   :  { %v1559_v45 = vpop.permute.xlu1 %1558 }
 0x8dd   :  { %v1560_v46 = vunpack.i.l.bf16 %v1559_v45  ;;  %v1561_v49 = vunpack.i.h.bf16 %v1559_v45 }
 0x8de   :  { %1503 = vmatmul.msk.f32.gmra.mxu0 %vm157_vm1, %v1016_v39 }
 0x8df   :  { %1004 = vmatpush.msra.mxu2 %v1560_v46 }
 0x8e1   :  { %1005 = vmatpush.msra.mxu2 %v1561_v49 }
 0x93f   :  { %v946_v40 = vpop.f32.mrf.mxu3 }
 0x940   :  { %v952_v52 = vmul.f32 0.35355338, %v946_v40 }
 0x941   :  { %v846_v54 = vpop.f32.mrf.mxu0 }
 0x942   :  { %v852_v10 = vmul.f32 0.35355338, %v846_v54  ;;  %v954_v41 = vsel %vm1889_vm2, %v952_v52, -1e+30 }
 0x943   :  { %v956_v12 = vsel %vm193_vm3, %v954_v41, -inf }
 0x944   :  { %957 = vmax.xlane.f32.xlu2 %v956_v12  ;;  %v854_v42 = vsel %vm1889_vm2, %v852_v10, -1e+30 }
 0x945   :  { %v856_v13 = vsel %vm193_vm3, %v854_v42, -inf }
 0x946   :  { %857 = vmax.xlane.f32.xlu1 %v856_v13 }
 0x947   :  { %v949_v55 = vpop.f32.mrf.mxu3 }
 0x948   :  { %v953_v58 = vmul.f32 0.35355338, %v949_v55 }
 0x949   :  { %v849_v59 = vpop.f32.mrf.mxu0 }
 0x94a   :  { %v853_v61 = vmul.f32 0.35355338, %v849_v59  ;;  %v955_v62 = vsel %vm1902_vm4, %v953_v58, -1e+30 }
 0x94b   :  { %v959_v8 = vsel %vm193_vm3, %v955_v62, -inf }
 0x94c   :  { %960 = vmax.xlane.f32.xlu0 %v959_v8  ;;  %v855_v15 = vsel %vm1902_vm4, %v853_v61, -1e+30 }
 0x94d   :  { %v859_v16 = vsel %vm193_vm3, %v855_v15, -inf }
 0x94e   :  { %860 = vmax.xlane.f32.xlu2 %v859_v16 }
 0x94f   :  { %v1146_v17 = vpop.f32.mrf.mxu3 }
 0x950   :  { %v1152_v18 = vmul.f32 0.35355338, %v1146_v17 }
 0x952   :  { %v1154_v5 = vsel %vm1889_vm2, %v1152_v18, -1e+30 }
 0x953   :  { %v1046_v19 = vpop.f32.mrf.mxu0  ;;  %v1156_v9 = vsel %vm193_vm3, %v1154_v5, -inf }
 0x954   :  { %v1052_v21 = vmul.f32 0.35355338, %v1046_v19  ;;  %1157 = vmax.xlane.f32.xlu1 %v1156_v9 }
 0x956   :  { %v1054_v6 = vsel %vm1889_vm2, %v1052_v21, -1e+30 }
 0x957   :  { %v1056_v22 = vsel %vm193_vm3, %v1054_v6, -inf  ;;  %v1149_v11 = vpop.f32.mrf.mxu3 }
 0x958   :  { %1057 = vmax.xlane.f32.xlu0 %v1056_v22  ;;  %v1153_v0 = vmul.f32 0.35355338, %v1149_v11 }
 0x95a   :  { %v2208_v26 = vsel %vm1902_vm4, %v1153_v0, -1e+30 }
 0x95b   :  { %v1049_v25 = vpop.f32.mrf.mxu0  ;;  %v1159_v29 = vsel %vm193_vm3, %v2208_v26, -inf }
 0x95c   :  { %v1053_v28 = vmul.f32 0.35355338, %v1049_v25  ;;  %1160 = vmax.xlane.f32.xlu2 %v1159_v29 }
 0x95e   :  { %v1055_v7 = vsel %vm1902_vm4, %v1053_v28, -1e+30 }
 0x95f   :  { %v1059_v32 = vsel %vm193_vm3, %v1055_v7, -inf }
 0x960   :  { %1060 = vmax.xlane.f32.xlu1 %v1059_v32 }
 0x979   :  { %1568 = vrot.lane.b32.xlu1 %v2156_v30, %s1749_s22 }
 0x9b7   :  { %v958_v31 = vpop.xlane.xlu2 %957 }
 0x9b8   :  { %v962_v33 = vsub.f32 %v954_v41, %v958_v31 }
 0x9b9   :  { %v858_v34 = vpop.xlane.xlu1 %857 }
 0x9ba   :  { %v964_v36 = vmul.f32 1.442695, %v962_v33  ;;  %v862_v27 = vsub.f32 %v854_v42, %v858_v34 }
 0x9bc   :  { %1619 = vpow2.f32 %v964_v36  ;;  %v864_v38 = vmul.f32 1.442695, %v862_v27 }
 0x9be   :  { %1621 = vpow2.f32 %v864_v38 }
 0x9bf   :  { %v961_v43 = vpop.xlane.xlu0 %960 }
 0x9c0   :  { %v963_v44 = vsub.f32 %v955_v62, %v961_v43 }
 0x9c1   :  { %v861_v47 = vpop.xlane.xlu2 %860 }
 0x9c2   :  { %v1620_v48 = vpop.eup %1619  ;;  %v863_v51 = vsub.f32 %v855_v15, %v861_v47  ;;  %v966_v46 = vmul.f32 1.442695, %v963_v44 }
 0x9c3   :  { %v968_v50 = vsel %vm193_vm3, %v1620_v48, 0.0 }
 0x9c4   :  { %v2218_v53 = vpop.eup %1621  ;;  %v866_v39 = vmul.f32 1.442695, %v863_v51  ;;  %969 = vadd.xlane.f32.xlu0 %v968_v50 }
 0x9c5   :  { %v868_v45 = vsel %vm193_vm3, %v2218_v53, 0.0 }
 0x9c6   :  { %1623 = vpow2.f32 %v866_v39  ;;  %869 = vadd.xlane.f32.xlu2 %v868_v45 }
 0x9c7   :  { %v1158_v49 = vpop.xlane.xlu1 %1157  ;;  %1625 = vpow2.f32 %v966_v46 }
 0x9c8   :  { %v1162_v55 = vsub.f32 %v1154_v5, %v1158_v49 }
 0x9ca   :  { %v1164_v61 = vmul.f32 1.442695, %v1162_v55 }
 0x9cb   :  { %v1058_v40 = vpop.xlane.xlu0 %1057 }
 0x9cc   :  { %v1624_v52 = vpop.eup %1623  ;;  %v1062_v54 = vsub.f32 %v1054_v6, %v1058_v40 }
 0x9cd   :  { %v871_v10 = vsel %vm193_vm3, %v1624_v52, 0.0  ;;  %v1626_v12 = vpop.eup %1625 }
 0x9ce   :  { %872 = vadd.xlane.f32.xlu0 %v871_v10  ;;  %v1064_v41 = vmul.f32 1.442695, %v1062_v54  ;;  %v971_v59 = vsel %vm193_vm3, %v1626_v12, 0.0 }
 0x9cf   :  { %v1161_v9 = vpop.xlane.xlu2 %1160 }
 0x9d0   :  { %1627 = vpow2.f32 %v1064_v41  ;;  %v1163_v6 = vsub.f32 %v2208_v26, %v1161_v9 }
 0x9d2   :  { %v1166_v22 = vmul.f32 1.442695, %v1163_v6 }
 0x9d3   :  { %v1061_v42 = vpop.xlane.xlu1 %1060 }
 0x9d4   :  { %v1063_v13 = vsub.f32 %v1055_v7, %v1061_v42 }
 0x9d6   :  { %v1066_v58 = vmul.f32 1.442695, %v1063_v13  ;;  %972 = vadd.xlane.f32.xlu0 %v971_v59  ;;  %v2224_v62 = vpop.eup %1627 }
 0x9d7   :  { %v1068_v15 = vsel %vm193_vm3, %v2224_v62, 0.0 }
 0x9d8   :  { %1629 = vpow2.f32 %v1066_v58 }
 0x9d9   :  { %1631 = vpow2.f32 %v1164_v61 }
 0x9da   :  { %1633 = vpow2.f32 %v1166_v22 }
 0x9de   :  { %v2226_v8 = vpop.eup %1629  ;;  %1563 = vrot.lane.b32.xlu2 %v2156_v30, %s1748_s21  ;;  %1069 = vadd.xlane.f32.xlu0 %v1068_v15 }
 0x9df   :  { %v1071_v16 = vsel %vm193_vm3, %v2226_v8, 0.0  ;;  %v1632_v17 = vpop.eup %1631 }
 0x9e0   :  { %1072 = vadd.xlane.f32.xlu1 %v1071_v16  ;;  %v1168_v18 = vsel %vm193_vm3, %v1632_v17, 0.0  ;;  %v1634_v11 = vpop.eup %1633 }
 0x9e1   :  { %v1171_v0 = vsel %vm193_vm3, %v1634_v11, 0.0 }
 0x9e6   :  { %1169 = vadd.xlane.f32.xlu0 %v1168_v18 }
 0x9eb   :  { %v1569_v19 = vpop.permute.xlu1 %1568 }
 0x9ec   :  { %v1570_v5 = vunpack.i.l.bf16 %v1569_v19  ;;  %v1571_v21 = vunpack.i.h.bf16 %v1569_v19 }
 0x9ee   :  { %1204 = vmatpush.msrb.mxu2 %v1570_v5 }
 0x9f0   :  { %1205 = vmatpush.msrb.mxu2 %v1571_v21 }
 0x9fa   :  { %1573 = vrot.lane.b32.xlu0 %v2156_v30, %s1751_s24 }
 0xa07   :  { %1172 = vadd.xlane.f32.xlu2 %v1171_v0 }
 0xa37   :  { %v970_v25 = vpop.xlane.xlu0 %969 }
 0xa38   :  { %1635 = vrcp.f32 %v970_v25 }
 0xa39   :  { %v870_v28 = vpop.xlane.xlu2 %869 }
 0xa3a   :  { %1637 = vrcp.f32 %v870_v28 }
 0xa3e   :  { %v1636_v29 = vpop.eup %1635 }
 0xa3f   :  { %v976_v7 = vmul.f32 %v1636_v29, %v1620_v48 }
 0xa40   :  { %v1638_v26 = vpop.eup %1637 }
 0xa41   :  { %1498 = vmatmul.msk.f32.vlgmr.msra.gmra.mxu2 %vm193_vm3, %v976_v7  ;;  %v873_v32 = vpop.xlane.xlu0 %872  ;;  %v1564_v31 = vpop.permute.xlu2 %1563  ;;  %v876_v30 = vmul.f32 %v1638_v26, %v2218_v53 }
 0xa42   :  { %v1565_v33 = vunpack.i.l.bf16 %v1564_v31  ;;  %1639 = vrcp.f32 %v873_v32  ;;  %v1566_v34 = vunpack.i.h.bf16 %v1564_v31 }
 0xa44   :  { %904 = vmatpush.msrb.mxu1 %v1565_v33 }
 0xa46   :  { %905 = vmatpush.msrb.mxu1 %v1566_v34 }
 0xa47   :  { %1492 = vmatmul.msk.f32.vlgmr.msrb.gmra.mxu1 %vm193_vm3, %v876_v30 }
 0xa48   :  { %v1640_v27 = vpop.eup %1639 }
 0xa49   :  { %v973_v36 = vpop.xlane.xlu0 %972  ;;  %v877_v38 = vmul.f32 %v1640_v27, %v1624_v52 }
 0xa4a   :  { %1641 = vrcp.f32 %v973_v36 }
 0xa4f   :  { %1493 = vmatmul.msk.f32.gmra.mxu1 %vm193_vm3, %v877_v38 }
 0xa50   :  { %v1642_v43 = vpop.eup %1641 }
 0xa51   :  { %v1070_v47 = vpop.xlane.xlu0 %1069  ;;  %v977_v48 = vmul.f32 %v1642_v43, %v1626_v12 }
 0xa53   :  { %1499 = vmatmul.msk.f32.gmra.mxu2 %vm193_vm3, %v977_v48  ;;  %v1073_v53 = vpop.xlane.xlu1 %1072 }
 0xa59   :  { %v1170_v51 = vpop.xlane.xlu0 %1169 }
 0xa5a   :  { %1643 = vrcp.f32 %v1170_v51 }
 0xa5b   :  { %1645 = vrcp.f32 %v1070_v47 }
 0xa5c   :  { %1647 = vrcp.f32 %v1073_v53 }
 0xa60   :  { %v1644_v50 = vpop.eup %1643 }
 0xa61   :  { %v1176_v44 = vmul.f32 %v1644_v50, %v1632_v17  ;;  %v1646_v45 = vpop.eup %1645 }
 0xa62   :  { %v1076_v40 = vmul.f32 %v1646_v45, %v2224_v62  ;;  %v1648_v52 = vpop.eup %1647 }
 0xa63   :  { %1510 = vmatmul.msk.f32.vlgmr.msrb.gmra.mxu2 %vm193_vm3, %v1176_v44  ;;  %v1077_v54 = vmul.f32 %v1648_v52, %v2226_v8 }
 0xa6c   :  { %v1574_v39 = vpop.permute.xlu0 %1573 }
 0xa6d   :  { %v1575_v46 = vunpack.i.l.bf16 %v1574_v39  ;;  %v1576_v49 = vunpack.i.h.bf16 %v1574_v39 }
 0xa6f   :  { %1104 = vmatpush.msra.mxu1 %v1575_v46 }
 0xa71   :  { %1105 = vmatpush.msra.mxu1 %v1576_v49 }
 0xa72   :  { %1504 = vmatmul.msk.f32.vlgmr.msra.gmra.mxu1 %vm193_vm3, %v1076_v40 }
 0xa73   :  { %1340 = vmatpush.msrb.mxu1 %v2019_v1 }
 0xa75   :  { %1341 = vmatpush.msrb.mxu1 %v2025_v2 }
 0xa77   :  { %1342 = vmatpush.msrb.mxu1 %v2031_v23 }
 0xa79   :  { %1343 = vmatpush.msrb.mxu1 %v2036_v3 }
 0xa7a   :  { %v1173_v10 = vpop.xlane.xlu2 %1172  ;;  %1505 = vmatmul.msk.f32.gmra.mxu1 %vm193_vm3, %v1077_v54 }
 0xa7b   :  { %1649 = vrcp.f32 %v1173_v10 }
 0xa81   :  { %v1650_v41 = vpop.eup %1649 }
 0xa82   :  { %v1177_v12 = vmul.f32 %v1650_v41, %v1634_v11 }
 0xa84   :  { %1511 = vmatmul.msk.f32.gmra.mxu2 %vm193_vm3, %v1177_v12 }
 0xac4   :  { %v1007_v42 = vpop.f32.mrf.mxu2  ;;  %v907_v1 = vpop.f32.mrf.mxu1 }
 0xac5   :  { %1215 = vrot.lane.b32.xlu0 %v1007_v42, %s1739_s30 }
 0xacc   :  { %v910_v55 = vpop.f32.mrf.mxu1 }
 0xad6   :  { %v1010_v13 = vpop.f32.mrf.mxu2 }
 0xae6   :  { %v1207_v2 = vpop.f32.mrf.mxu2 }
 0xae7   :  { %1231 = vrot.lane.b32.xlu2 %v1207_v2, %s1752_s25 }
 0xaef   :  { %v1107_v23 = vpop.f32.mrf.mxu1 }
 0xaf0   :  { %1223 = vrot.lane.b32.xlu0 %v1107_v23, %s1753_s26 }
 0xaf7   :  { %v1110_v3 = vpop.f32.mrf.mxu1 }
 0xaf8   :  { %1217 = vrot.lane.b32.xlu0 %v1010_v13, %s1739_s30  ;;  %1225 = vrot.lane.b32.xlu1 %v1110_v3, %s1753_s26 }
 0xb07   :  { %v1210_v58 = vpop.f32.mrf.mxu2 }
 0xb08   :  { %1233 = vrot.lane.b32.xlu0 %v1210_v58, %s1752_s25 }
 0xb37   :  { %v1216_v59 = vpop.permute.xlu0 %1215 }
 0xb38   :  { %v1237_v61 = vsel %vm157_vm1, %v907_v1, %v1216_v59 }
 0xb41   :  { %v1232_v8 = vpop.permute.xlu2 %1231 }
 0xb62   :  { %v1224_v62 = vpop.permute.xlu0 %1223 }
 0xb63   :  { %v1239_v15 = vsel %vm193_vm3, %v1237_v61, %v1224_v62 }
 0xb64   :  { %v1241_v16 = vsel %vm579_vm5, %v1239_v15, %v1232_v8 }
 0xb65   :  { %1512 = vmatmul.msk.f32.vlgmr.msrb.gmra.mxu0 %vm121_vm0, %v1241_v16 }
 0xb6a   :  { %v1218_v17 = vpop.permute.xlu0 %1217  ;;  %v1226_v19 = vpop.permute.xlu1 %1225 }
 0xb6b   :  { %v1238_v18 = vsel %vm157_vm1, %v910_v55, %v1218_v17 }
 0xb6c   :  { %v1240_v5 = vsel %vm193_vm3, %v1238_v18, %v1226_v19 }
 0xb7a   :  { %v1234_v21 = vpop.permute.xlu0 %1233 }
 0xb7b   :  { %v1242_v9 = vsel %vm579_vm5, %v1240_v5, %v1234_v21 }
 0xb7c   :  { %1513 = vmatmul.msk.f32.gmra.mxu0 %vm121_vm0, %v1242_v9 }
 0xbe2   :  { %v1266_v6 = vpop.f32.mrf.mxu0 }
 0xbe3   :  { %v1267_v22 = vadd.f32 %v1266_v6, %v2002_v57 }
 0xbe5   :  { %v1272_v11 = vadd.f32 %v1267_v22, %v2129_v14 }
 0xbe7   :  { %v1274_v0 = vsel %vm121_vm0, %v1272_v11, 0.0 }
 0xbe8   :  { %1275 = vadd.xlane.f32.xlu0 %v1274_v0 }
 0xbf9   :  { %v1269_v25 = vpop.f32.mrf.mxu0 }
 0xbfa   :  { %v1270_v28 = vadd.f32 %v1269_v25, %v2002_v57 }
 0xbfc   :  { %v1273_v29 = vadd.f32 %v1270_v28, %v2136_v24 }
 0xbfe   :  { %v1277_v7 = vsel %vm121_vm0, %v1273_v29, 0.0 }
 0xbff   :  { %1278 = vadd.xlane.f32.xlu2 %v1277_v7 }
 0xc5b   :  { %v1276_v32 = vpop.xlane.xlu0 %1275 }
 0xc5c   :  { %v1280_v31 = vmul.f32 %v1276_v32, %v2010_v4 }
 0xc5e   :  { %v1282_v26 = vsub.f32 %v1272_v11, %v1280_v31 }
 0xc60   :  { %v1284_v33 = vmul.f32 %v1282_v26, %v1282_v26 }
 0xc62   :  { %v1286_v34 = vsel %vm121_vm0, %v1284_v33, 0.0 }
 0xc63   :  { %1287 = vadd.xlane.f32.xlu1 %v1286_v34 }
 0xc72   :  { %v1279_v14 = vpop.xlane.xlu2 %1278 }
 0xc73   :  { %v1281_v30 = vmul.f32 %v1279_v14, %v2010_v4 }
 0xc75   :  { %v1283_v36 = vsub.f32 %v1273_v29, %v1281_v30 }
 0xc77   :  { %v1285_v27 = vmul.f32 %v1283_v36, %v1283_v36 }
 0xc79   :  { %v1289_v57 = vsel %vm121_vm0, %v1285_v27, 0.0 }
 0xc7a   :  { %1290 = vadd.xlane.f32.xlu0 %v1289_v57 }
 0xcd6   :  { %v1288_v24 = vpop.xlane.xlu1 %1287 }
 0xcd7   :  { %v1292_v38 = vmul.f32 %v1288_v24, %v2010_v4 }
 0xcd9   :  { %v1294_v43 = vadd.f32 1e-05, %v1292_v38 }
 0xcdb   :  { %1651 = vrsqrt.f32 %v1294_v43  ;;  %vm1302_vm2 = vweird.f32 %v1294_v43 }
 0xce1   :  { %v1652_v47 = vpop.eup %1651 }
 0xce2   :  { %v1297_v48 = vmul.f32 %v1652_v47, %v1294_v43  ;;  %vm1303_vm1 = vweird.f32 %v1652_v47 }
 0xce3   :  { %vm1304_vm3 = vmor %vm1302_vm2, %vm1303_vm1 }
 0xce4   :  { %v1298_v51 = vmul.f32 %v1652_v47, %v1297_v48 }
 0xce6   :  { %v1299_v50 = vmul.f32 0.5, %v1298_v51 }
 0xce8   :  { %v1300_v44 = vsub.f32 1.5, %v1299_v50 }
 0xcea   :  { %v1301_v53 = vmul.f32 %v1652_v47, %v1300_v44 }
 0xcec   :  { %v1305_v39 = vsel %vm1304_vm3, %v1652_v47, %v1301_v53 }
 0xced   :  { %v1316_v45 = vmul.f32 %v1305_v39, %v1282_v26  ;;  %v1291_v46 = vpop.xlane.xlu0 %1290 }
 0xcee   :  { %v1293_v49 = vmul.f32 %v1291_v46, %v2010_v4 }
 0xcef   :  { %v1318_v40 = vmul.f32 %v1316_v45, %v2042_v35 }
 0xcf0   :  { %v1295_v52 = vadd.f32 1e-05, %v1293_v49 }
 0xcf1   :  { %v1320_v54 = vadd.f32 %v1318_v40, %v2045_v37 }
 0xcf2   :  { %1653 = vrsqrt.f32 %v1295_v52  ;;  %vm1312_vm5 = vweird.f32 %v1295_v52 }
 0xcf3   :  { %1514 = vmatmul.msk.f32.vlgmr.msrb.gmra.mxu1 %vm121_vm0, %v1320_v54 }
 0xcf8   :  { %v1654_v10 = vpop.eup %1653 }
 0xcf9   :  { %v1307_v41 = vmul.f32 %v1654_v10, %v1295_v52  ;;  %vm1313_vm4 = vweird.f32 %v1654_v10 }
 0xcfa   :  { %vm1314_vm10 = vmor %vm1312_vm5, %vm1313_vm4 }
 0xcfb   :  { %v1308_v12 = vmul.f32 %v1654_v10, %v1307_v41 }
 0xcfd   :  { %v1309_v42 = vmul.f32 0.5, %v1308_v12 }
 0xcff   :  { %v1310_v1 = vsub.f32 1.5, %v1309_v42 }
 0xd01   :  { %v1311_v13 = vmul.f32 %v1654_v10, %v1310_v1 }
 0xd03   :  { %v1315_v2 = vsel %vm1314_vm10, %v1654_v10, %v1311_v13 }
 0xd04   :  { %v1317_v55 = vmul.f32 %v1315_v2, %v1283_v36 }
 0xd06   :  { %v1319_v23 = vmul.f32 %v1317_v55, %v2042_v35 }
 0xd08   :  { %v1321_v3 = vadd.f32 %v1319_v23, %v2045_v37 }
 0xd0a   :  { %1515 = vmatmul.msk.f32.gmra.mxu1 %vm121_vm0, %v1321_v3 }
 0xd70   :  { %v1345_v58 = vpop.f32.mrf.mxu1 }
 0xd71   :  { %v1346_v59 = vadd.f32 %v1345_v58, %v2103_v56 }
 0xd73   :  { %v1351_v61 = vmax.f32 %v1346_v59, 0.0 }
 0xd75   :  { %1516 = vmatmul.msk.f32.vlgmr.msrb.gmra.mxu3 %vm704_vm13, %v1351_v61 }
 0xd87   :  { %v1348_v62 = vpop.f32.mrf.mxu1 }
 0xd88   :  { %v1349_v8 = vadd.f32 %v1348_v62, %v2103_v56 }
 0xd8a   :  { %v1352_v15 = vmax.f32 %v1349_v8, 0.0 }
 0xd8c   :  { %1517 = vmatmul.msk.f32.gmra.mxu3 %vm704_vm13, %v1352_v15 }
 0xdf8   :  { %v1376_v16 = vpop.f32.mrf.mxu3 }
 0xdf9   :  { %v1377_v17 = vadd.f32 %v1376_v16, %v2110_v20 }
 0xdfb   :  { %v1382_v35 = vadd.f32 %v1377_v17, %v1320_v54 }
 0xdfd   :  { %v1384_v37 = vsel %vm121_vm0, %v1382_v35, 0.0 }
 0xdfe   :  { %1385 = vadd.xlane.f32.xlu2 %v1384_v37 }
 0xe0f   :  { %v1379_v18 = vpop.f32.mrf.mxu3 }
 0xe10   :  { %v1380_v19 = vadd.f32 %v1379_v18, %v2110_v20 }
 0xe12   :  { %v1383_v5 = vadd.f32 %v1380_v19, %v1321_v3 }
 0xe14   :  { %v1387_v21 = vsel %vm121_vm0, %v1383_v5, 0.0 }
 0xe15   :  { %1388 = vadd.xlane.f32.xlu0 %v1387_v21 }
 0xe71   :  { %v1386_v9 = vpop.xlane.xlu2 %1385 }
 0xe72   :  { %v1390_v56 = vmul.f32 %v1386_v9, %v2010_v4 }
 0xe74   :  { %v1392_v6 = vsub.f32 %v1382_v35, %v1390_v56 }
 0xe76   :  { %v1394_v22 = vmul.f32 %v1392_v6, %v1392_v6 }
 0xe78   :  { %v1396_v11 = vsel %vm121_vm0, %v1394_v22, 0.0 }
 0xe79   :  { %1397 = vadd.xlane.f32.xlu2 %v1396_v11 }
 0xe88   :  { %v1389_v0 = vpop.xlane.xlu0 %1388 }
 0xe89   :  { %v1391_v25 = vmul.f32 %v1389_v0, %v2010_v4 }
 0xe8b   :  { %v1393_v28 = vsub.f32 %v1383_v5, %v1391_v25 }
 0xe8d   :  { %v1395_v29 = vmul.f32 %v1393_v28, %v1393_v28 }
 0xe8f   :  { %v1399_v7 = vsel %vm121_vm0, %v1395_v29, 0.0 }
 0xe90   :  { %1400 = vadd.xlane.f32.xlu1 %v1399_v7 }
 0xeec   :  { %v1398_v20 = vpop.xlane.xlu2 %1397 }
 0xeed   :  { %v1402_v32 = vmul.f32 %v1398_v20, %v2010_v4 }
 0xeef   :  { %v1404_v31 = vadd.f32 1e-05, %v1402_v32 }
 0xef1   :  { %1655 = vrsqrt.f32 %v1404_v31  ;;  %vm1412_vm12 = vweird.f32 %v1404_v31 }
 0xef7   :  { %v1656_v26 = vpop.eup %1655 }
 0xef8   :  { %v1407_v33 = vmul.f32 %v1656_v26, %v1404_v31  ;;  %vm1413_vm11 = vweird.f32 %v1656_v26 }
 0xef9   :  { %vm1414_vm13 = vmor %vm1412_vm12, %vm1413_vm11 }
 0xefa   :  { %v1408_v34 = vmul.f32 %v1656_v26, %v1407_v33 }
 0xefc   :  { %v1409_v14 = vmul.f32 0.5, %v1408_v34 }
 0xefe   :  { %v1410_v30 = vsub.f32 1.5, %v1409_v14 }
 0xf00   :  { %v1411_v36 = vmul.f32 %v1656_v26, %v1410_v30 }
 0xf02   :  { %v1415_v27 = vsel %vm1414_vm13, %v1656_v26, %v1411_v36 }
 0xf03   :  { %v1426_v57 = vmul.f32 %v1415_v27, %v1392_v6  ;;  %v1401_v24 = vpop.xlane.xlu1 %1400 }
 0xf04   :  { %v1403_v38 = vmul.f32 %v1401_v24, %v2010_v4 }
 0xf05   :  { %v1428_v43 = vmul.f32 %v1426_v57, %v2122_v60 }
 0xf06   :  { %v1405_v47 = vadd.f32 1e-05, %v1403_v38 }
 0xf07   :  { %v1430_v48 = vadd.f32 %v1428_v43, %v2125_v63 }
 0xf08   :  { %1657 = vrsqrt.f32 %v1405_v47  ;;  %vm1422_vm15 = vweird.f32 %v1405_v47 }
 0xf09   :  { %1432 = vst.msk [vmem:[#allocation7] sm:$0xff] %vm121_vm0, %v1430_v48 }
 0xf0e   :  { %v1658_v51 = vpop.eup %1657 }
 0xf0f   :  { %v1417_v50 = vmul.f32 %v1658_v51, %v1405_v47  ;;  %vm1423_vm14 = vweird.f32 %v1658_v51 }
 0xf10   :  { %vm1424_vm6 = vmor %vm1422_vm15, %vm1423_vm14 }
 0xf11   :  { %v1418_v44 = vmul.f32 %v1658_v51, %v1417_v50 }
 0xf13   :  { %v1419_v53 = vmul.f32 0.5, %v1418_v44 }
 0xf15   :  { %v1420_v39 = vsub.f32 1.5, %v1419_v53 }
 0xf17   :  { %v1421_v45 = vmul.f32 %v1658_v51, %v1420_v39 }
 0xf19   :  { %v1425_v46 = vsel %vm1424_vm6, %v1658_v51, %v1421_v45 }
 0xf1a   :  { %v1427_v49 = vmul.f32 %v1425_v46, %v1393_v28 }
 0xf1c   :  { %v1429_v4 = vmul.f32 %v1427_v49, %v2122_v60 }
 0xf1e   :  { %v1431_v40 = vadd.f32 %v1429_v4, %v2125_v63 }
 0xf20   :  { %1433 = vst.msk [vmem:[#allocation7 + $0x8] sm:$0xff] %vm121_vm0, %v1431_v40 }
 0xf21   :  { %1446 = dma.vmem_to_hbm [thread:$0]  %s1439_s1, 256, %s1441_s17, [#allocation4], %s1738_s29, %s1738_s29, %s1739_s30  }
 0xf22   :  { %1735 = dma.done.wait [#allocation4], 256  }
 0xf23   :  { %1736 = vsyncadd [#allocation4], 4294967040 }
 0xf24   :  { %1451 = vsyncpa [#allocation3], 1 }
 0xf25   :  { %1452 = vsyncpa [#allocation6], 1 }
 0xf26   :  { %1453 = vsyncpa [#allocation4], 1 }

</bundles_post_ra>
